<compile_context>
chip_gen: v5e
topology: v5e:2x2
jax: 0.10.0
libtpu: 0.0.40
codegen_flags: <defaults>
</compile_context>

<pallas_src>
import jax
import jax.numpy as jnp
from jax.experimental import pallas as pl
from jax.experimental.pallas import tpu as pltpu


_VMEM_LIMIT_BYTES = 32 * 1024 * 1024   # <= scoped/physical VMEM on v5e/v6e/v7x
_RESIDENT_RHS_BYTES = 4 * 1024 * 1024  # keep RHS fully VMEM-resident below this
_TILE_BYTES = 4 * 1024 * 1024          # per-buffer tile budget in resident path


def _round_up(x: int, m: int) -> int:
    return ((x + m - 1) // m) * m


def _cdiv(a: int, b: int) -> int:
    return (a + b - 1) // b


def _pick_tile(size: int, align: int, cap: int):
    """Largest tile (multiple of `align`, <= cap) minimizing the padded extent."""
    padded_min = _round_up(size, align)
    if padded_min <= cap:
        return padded_min, padded_min
    best_t, best_p = None, None
    t = (cap // align) * align
    while t >= align:
        p = _round_up(size, t)
        if best_p is None or p < best_p:
            best_p, best_t = p, t
        t -= align
    return best_t, best_p


# ----------------------------------------------------------------------------
# Kernels
# ----------------------------------------------------------------------------
def _dot_once_kernel(a_ref, b_ref, o_ref):
    # Single K pass: write the product straight to the output block.
    o_ref[...] = jnp.dot(a_ref[...], b_ref[...],
                         preferred_element_type=jnp.float32)


def _dot_acc_kernel(a_ref, b_ref, o_ref):
    # K is tiled: accumulate directly into the resident f32 output block
    # (no scratch, no per-K copy -> frees the scarce vst slot).
    @pl.when(pl.program_id(2) == 0)
    def _():
        o_ref[...] = jnp.zeros_like(o_ref)

    o_ref[...] += jnp.dot(a_ref[...], b_ref[...],
                          preferred_element_type=jnp.float32)


# ----------------------------------------------------------------------------
# Generic lane-dense tiled matmul: (M, K) @ (K, N) -> (M, N) f32
# ----------------------------------------------------------------------------
def _tiled_matmul(a, b, *, use_bf16=False):
    M, K = a.shape
    Kb, N = b.shape
    assert K == Kb, (a.shape, b.shape)

    op_dtype = jnp.bfloat16 if use_bf16 else jnp.float32
    itemsize = jnp.dtype(op_dtype).itemsize
    a = a.astype(op_dtype)
    b = b.astype(op_dtype)

    Kp = _round_up(K, 128)
    Np = _round_up(N, 128)
    Mp = _round_up(M, 8)

    resident_rhs = (Kp * Np * itemsize <= _RESIDENT_RHS_BYTES) and (Kp <= 2048)

    if resident_rhs:
        # ---- Path R: RHS fully VMEM-resident (constant index_map -> one DMA),
        # grid only tiles M.  For tiny problems this is a single-step call with
        # one jnp.dot and zero accumulator machinery.
        tm = 512
        tm = min(tm, max(8, (_TILE_BYTES // (4 * Np)) // 8 * 8))          # out tile (f32)
        tm = min(tm, max(8, (_TILE_BYTES // (itemsize * Kp)) // 8 * 8))   # lhs tile
        tm = min(tm, Mp)
        n_m = _cdiv(Mp, tm)
        if n_m == 1 and Mp >= 128:
            # >=2 parallel tiles so v7x can shard the grid over both TCs.
            tm = _round_up(_cdiv(Mp, 2), 8)
            n_m = _cdiv(Mp, tm)
        Mp = n_m * tm

        a = jnp.pad(a, ((0, Mp - M), (0, Kp - K)))
        b = jnp.pad(b, ((0, Kp - K), (0, Np - N)))
        cost = pl.CostEstimate(
            flops=2 * Mp * Np * Kp, transcendentals=0,
            bytes_accessed=itemsize * (Mp * Kp + Kp * Np) + 4 * Mp * Np)

        out = pl.pallas_call(
            _dot_once_kernel,
            out_shape=jax.ShapeDtypeStruct((Mp, Np), jnp.float32),
            grid_spec=pltpu.PrefetchScalarGridSpec(
                num_scalar_prefetch=0,
                grid=(n_m,),
                in_specs=[
                    pl.BlockSpec((tm, Kp), lambda i: (i, 0)),
                    pl.BlockSpec((Kp, Np), lambda i: (0, 0)),  # constant -> single DMA
                ],
                out_specs=pl.BlockSpec((tm, Np), lambda i: (i, 0)),
            ),
            compiler_params=pltpu.CompilerParams(
                dimension_semantics=("parallel",),
                vmem_limit_bytes=_VMEM_LIMIT_BYTES),
            cost_estimate=cost,
        )(a, b)
        return out[:M, :N]

    # ---- Path T: full 3-D tiled grid, f32 accumulation in the output block.
    tk, Kp = _pick_tile(K, 128, 1024)
    tn, Np = _pick_tile(N, 128, 512)
    tm, Mp = _pick_tile(M, 8, 512)
    if (Mp // tm) == 1 and (Np // tn) == 1 and Np >= 256:
        # Ensure >=2 parallel tiles for v7x's two TensorCores.  Split along N
        # (not M) so the large streamed RHS is not read twice from HBM.
        tn, Np = _pick_tile(N, 128, max(128, (Np // 2) // 128 * 128))

    a = jnp.pad(a, ((0, Mp - M), (0, Kp - K)))
    b = jnp.pad(b, ((0, Kp - K), (0, Np - N)))
    grid = (Mp // tm, Np // tn, Kp // tk)
    cost = pl.CostEstimate(
        flops=2 * Mp * Np * Kp, transcendentals=0,
        bytes_accessed=itemsize * (Mp * Kp + Kp * Np) + 4 * Mp * Np)

    out = pl.pallas_call(
        _dot_acc_kernel,
        out_shape=jax.ShapeDtypeStruct((Mp, Np), jnp.float32),
        grid_spec=pltpu.PrefetchScalarGridSpec(
            num_scalar_prefetch=0,
            grid=grid,
            in_specs=[
                pl.BlockSpec((tm, tk), lambda i, j, k: (i, k)),
                pl.BlockSpec((tk, tn), lambda i, j, k: (k, j)),
            ],
            out_specs=pl.BlockSpec((tm, tn), lambda i, j, k: (i, j)),
        ),
        compiler_params=pltpu.CompilerParams(
            dimension_semantics=("parallel", "parallel", "arbitrary"),
            vmem_limit_bytes=_VMEM_LIMIT_BYTES),
        cost_estimate=cost,
    )(a, b)
    return out[:M, :N]


# ----------------------------------------------------------------------------
# Projection matrices: M[b, p] = xs[b]^T @ xprotos[p], shape (B, P, d, d)
# ----------------------------------------------------------------------------
def projection_matrices(xs, xprotos, *, protos_rhs=None, protos_lhs=None,
                        use_bf16=False):
    B, D, d = xs.shape
    P = xprotos.shape[0]
    Bd, Pd = B * d, P * d

    # Lane density: place the larger of (B*d, P*d) on the output lane (N) axis
    # when the natural N = P*d would be sub-128 (masked-store regime).
    swap = (Pd < 128) and (Bd > Pd)

    if not swap:
        # (B*d, D) @ (D, P*d)
        a = jnp.swapaxes(xs, 1, 2).reshape(Bd, D)
        if protos_rhs is None:
            protos_rhs = jnp.transpose(xprotos, (1, 0, 2)).reshape(D, Pd)
        out = _tiled_matmul(a, protos_rhs, use_bf16=use_bf16)       # (Bd, Pd)
        return jnp.transpose(out.reshape(B, d, P, d), (0, 2, 1, 3))

    # (P*d, D) @ (D, B*d), transpose the (small-P*d) result afterwards.
    if protos_lhs is None:
        protos_lhs = jnp.swapaxes(xprotos, 1, 2).reshape(Pd, D)
    bmat = jnp.transpose(xs, (1, 0, 2)).reshape(D, Bd)
    out = _tiled_matmul(protos_lhs, bmat, use_bf16=use_bf16)        # (Pd, Bd)
    return jnp.transpose(out.reshape(P, d, B, d), (2, 0, 3, 1))


# ----------------------------------------------------------------------------
# Forward pass (== GeodesicPrototypeLayer.forward, metric_type='geodesic')
# ----------------------------------------------------------------------------
def prototype_layer_forward(xs_subspace, xprotos, relevances, *,
                            protos_rhs=None, protos_lhs=None, use_bf16=False):
    assert xs_subspace.ndim == 3, xs_subspace.shape

    # Pallas hot path: all B*P projection matrices in one MXU-friendly matmul.
    Mproj = projection_matrices(xs_subspace, xprotos,
                                protos_rhs=protos_rhs, protos_lhs=protos_lhs,
                                use_bf16=use_bf16)                 # (B, P, d, d)

    # TODO(synk): batched d x d SVD has no Pallas TPU equivalent; stays in jnp.linalg.svd.
    U, S, Vh = jnp.linalg.svd(Mproj, full_matrices=False)
    Qw = jnp.swapaxes(Vh, -2, -1)                                  # (B, P, d, d)

    # arccos + relevance-weighted reduction is O(B*P*d) elementwise work after
    # the SVD; a standalone pallas_call costs more than the compute, so leave
    # it to XLA fusion.  clip guards |S| > 1 float noise (torch.acos would NaN
    # there; the reference code raises on NaN, which we cannot do under jit).
    theta2 = jnp.square(jnp.arccos(jnp.clip(S, -1.0, 1.0)))        # (B, P, d)
    distance = jnp.einsum('k,bpk->bp',
                          relevances[0].astype(jnp.float32),
                          theta2.astype(jnp.float32))
    return distance, Qw


# ----------------------------------------------------------------------------
# Module-equivalent parameter container (deterministic init, mirrors init_randn)
# ----------------------------------------------------------------------------
class PrototypeLayer:
    def __init__(self, num_prototypes, num_classes, dim_of_data, dim_of_subspace,
                 metric_type='geodesic', key=None, use_bf16=False):
        if key is None:
            key = jax.random.PRNGKey(0)
        total_protos = num_classes * num_prototypes
        g = jax.random.normal(key, (total_protos, dim_of_data, dim_of_subspace),
                              dtype=jnp.float32)
        q, _ = jnp.linalg.qr(g, mode='reduced')                    # orthonormal bases
        self.xprotos = q                                           # (P, D, d)
        self.yprotos = jnp.repeat(jnp.arange(num_classes),
                                  num_prototypes).astype(jnp.int32)
        self.yprotos_mat = jax.nn.one_hot(self.yprotos, num_classes,
                                          dtype=jnp.int32).T
        self.yprotos_comp_mat = (1 - self.yprotos_mat).astype(jnp.int32)
        self.relevances = (jnp.ones((1, dim_of_subspace), dtype=jnp.float32)
                           / dim_of_subspace)
        self.metric_type = metric_type
        self.number_of_prototypes = total_protos
        self.use_bf16 = use_bf16
        # Hoisted matmul-ready prototype layouts: the parameter-side transpose
        # is done once here instead of on every forward call.
        P, D, d = q.shape
        self.protos_rhs = jnp.transpose(q, (1, 0, 2)).reshape(D, P * d)   # (D, P*d)
        self.protos_lhs = jnp.swapaxes(q, 1, 2).reshape(P * d, D)         # (P*d, D)

    def __call__(self, xs_subspace):
        return prototype_layer_forward(
            xs_subspace, self.xprotos, self.relevances,
            protos_rhs=self.protos_rhs, protos_lhs=self.protos_lhs,
            use_bf16=self.use_bf16)


if __name__ == "__main__":
    key = jax.random.PRNGKey(0)
    k_proto, k_data = jax.random.split(key)

    B, D, d = 2, 16, 4                  # batch, dim_of_data, dim_of_subspace
    num_prototypes, num_classes = 1, 3  # -> P = 3 prototypes

    layer = PrototypeLayer(num_prototypes, num_classes, D, d, key=k_proto)

    # Input subspaces: orthonormal bases (B, D, d), as the model expects.
    raw = jax.random.normal(k_data, (B, D, d), dtype=jnp.float32)
    xs_subspace, _ = jnp.linalg.qr(raw, mode='reduced')

    fwd = jax.jit(lambda xs: prototype_layer_forward(
        xs, layer.xprotos, layer.relevances,
        protos_rhs=layer.protos_rhs, protos_lhs=layer.protos_lhs))
    distance, Qw = fwd(xs_subspace)
    distance = jax.block_until_ready(distance)
    Qw = jax.block_until_ready(Qw)

    # Pure-JAX reference for sanity.
    M_ref = jnp.einsum('bdk,pdl->bpkl', xs_subspace, layer.xprotos)
    _, S_ref, Vh_ref = jnp.linalg.svd(M_ref, full_matrices=False)
    dist_ref = jnp.einsum('k,bpk->bp', layer.relevances[0],
                          jnp.square(jnp.arccos(jnp.clip(S_ref, -1.0, 1.0))))

    P = num_prototypes * num_classes
    assert distance.shape == (B, P), distance.shape
    assert Qw.shape == (B, P, d, d), Qw.shape
    assert not bool(jnp.isnan(distance).any())
    assert jnp.allclose(distance, dist_ref, rtol=1e-4, atol=1e-4)

    print("KERNEL_OK")
</pallas_src>

<mosaic_0001>
module attributes {stable_mosaic.version = 11 : i64} {
  func.func @_dot_once_kernel(%arg0: i32, %arg1: memref<8x128xf32, #tpu.memory_space<vmem>>, %arg2: memref<128x128xf32, #tpu.memory_space<vmem>>, %arg3: memref<8x128xf32, #tpu.memory_space<vmem>>) attributes {dimension_semantics = [#tpu.dimension_semantics<parallel>], iteration_bounds = array<i64: 1>, scalar_prefetch = 0 : i64, scratch_operands = 0 : i64, tpu.core_type = #tpu.core_type<tc>, window_params = [{transform_indices = @transform_0, window_bounds = array<i64: 8, 128>}, {pipeline_mode = #tpu.pipeline_mode<synchronous>, transform_indices = @transform_1, window_bounds = array<i64: 128, 128>}, {transform_indices = @transform_2, window_bounds = array<i64: 8, 128>}]} {
    %c0 = arith.constant 0 : index
    %c0_0 = arith.constant 0 : index
    %0 = vector.load %arg1[%c0, %c0_0] : memref<8x128xf32, #tpu.memory_space<vmem>>, vector<8x128xf32>
    %c0_1 = arith.constant 0 : index
    %c0_2 = arith.constant 0 : index
    %1 = vector.load %arg2[%c0_1, %c0_2] : memref<128x128xf32, #tpu.memory_space<vmem>>, vector<128x128xf32>
    %cst = arith.constant dense<0.000000e+00> : vector<8x128xf32>
    %2 = tpu.matmul %0, %1, %cst {dimension_numbers = #tpu.dot_dimension_numbers<[1], [0], [0], [1], [0, 0, 1, 1], [], []>} : vector<8x128xf32>, vector<128x128xf32>, vector<8x128xf32> -> vector<8x128xf32>
    %c0_3 = arith.constant 0 : index
    %c0_4 = arith.constant 0 : index
    %3 = vector.load %arg3[%c0_3, %c0_4] : memref<8x128xf32, #tpu.memory_space<vmem>>, vector<8x128xf32>
    tpu.vector_store %arg3[%c0_3, %c0_4], %2 {strides = array<i32>} : memref<8x128xf32, #tpu.memory_space<vmem>>, vector<8x128xf32>,
    return
  }
  func.func @transform_0(%arg0: i32) -> (i32, i32) {
    %c0_i32 = arith.constant 0 : i32
    %c0_i32_0 = arith.constant 0 : i32
    return %arg0, %c0_i32 : i32, i32
  }
  func.func @transform_1(%arg0: i32) -> (i32, i32) {
    %c0_i32 = arith.constant 0 : i32
    %c0_i32_0 = arith.constant 0 : i32
    %c0_i32_1 = arith.constant 0 : i32
    return %c0_i32, %c0_i32_0 : i32, i32
  }
  func.func @transform_2(%arg0: i32) -> (i32, i32) {
    %c0_i32 = arith.constant 0 : i32
    %c0_i32_0 = arith.constant 0 : i32
    return %arg0, %c0_i32 : i32, i32
  }
}

</mosaic_0001>

<bundles_post_ra>
// kernel: custom-call.55
= control target key start
LH: loop header
LB: loop body
LE: loop exit
PB: predicated region body
PF: predicated region fallthrough
CT: control target
= control target key end

     0   :  { %s783_s9 = smov 0   ;;  %s785_s10 = smov 0   ;;  %s986_s0 = inlined_call_operand.vmem [shape: f32[2,3,8,4], index: 0, kind: input, shape index: {}]   ;;  %s987_s1 = inlined_call_operand.vmem [shape: f32[2,3,8,4], index: 1, kind: output, shape index: {0}]   ;;  %s988_s2 = inlined_call_operand.vmem [shape: f32[2,3,4], index: 2, kind: output, shape index: {1}]  }
   0x1   :  { %s787_s11 = smov 0   ;;  %s789_s12 = smov 0  }
   0x2   :  { %s791_s13 = smov 0   ;;  %s793_s14 = smov 0  }
   0x3   :  { %s795_s15 = smov 0  }
   0x4 LB: > { %s31_s16 = sadd.s32 1, %s752_s13  ;;  %s35_s17 = sadd.s32 1, %s756_s14  ;;  %s760_s15 = sphi %s795_s15, %s9_s15   ;;  %s756_s14 = sphi %s793_s14, %s999_s14   ;;  %s752_s13 = sphi %s791_s13, %s998_s13   ;;  %s748_s12 = sphi %s789_s12, %s997_s12   ;;  %s744_s11 = sphi %s787_s11, %s996_s11   ;;  %s740_s10 = sphi %s785_s10, %s995_s10   ;;  %s736_s9 = sphi %s783_s9, %s994_s9  }
   0x5   : > { %p33_p0 = scmp.ge.s32.totalorder %s31_s16, 3  ;;  %s40_s18 = ssub.s32 0, %s752_s13 }
   0x6   : > { %s606_s19 = smin.u32 %s752_s13, %s40_s18  ;;  %s604_s22 = sadd.s32 4294967295, %s760_s15  }
   0x7   : > { %s1001_s16 = smov (%p33_p0, %s31_s16), 0  ;;  %s1003_s17 = smov (!%p33_p0, %s35_s17), %s756_s14 }
   0x8   : > { %p37_p1 = scmp.ge.s32.totalorder %s1003_s17, 2  ;;  %s42_s20 = sshrl.u32 %s606_s19, 3 }
   0x9   : > { %s46_s21 = ssub.s32 0, %s1001_s16  ;;  %p66_p2 = scmp.ne.s32.totalorder %s740_s10, %s736_s9 }
   0xa   : > { %s1005_s17 = smov (%p37_p1, %s1003_s17), 0  ;;  %s607_s23 = smin.u32 %s46_s21, %s1001_s16 }
   0xb   : > { %s48_s24 = sshrl.u32 %s607_s23, 3  ;;  %s51_s25 = ssub.s32 %s756_s14, %s1005_s17 }
   0xc   : > { %p67_p3 = scmp.eq.s32.totalorder %s604_s22, 5  ;;  %s52_s26 = ssub.s32 %s42_s20, %s48_s24 }
   0xd   : > { %s56_s27 = sadd.s32 1, %s740_s10  ;;  %s53_s28 = sor.u32 %s52_s26, %s51_s25 }
   0xe   : > { %p835_p4 = por %p67_p3, %p66_p2  ;;  %p54_p5 = scmp.eq.s32.totalorder %s53_s28, 0 }
   0xf   : > { %p609_p6 = scmp.ge.s32.totalorder %s760_s15, 6 }
  0x10   : > { %s840_s30 = scalar_select %p54_p5, %s740_s10, %s56_s27  }
  0x11   : > { %89 = sbr.rel (%p609_p6) target bundleno = 25 (0x19), region = 16  ;;  %s91_s3 = sand.u32 (!%p609_p6), 1, %s760_s15  }
  0x12   : > { %s624_s4 = smul.u32 (!%p609_p6), 3, %s756_s14  ;;  %s610_s5 = sshll.u32 (!%p609_p6), %s91_s3, 3 }
  0x13   : > { %s93_s20 = scalar_lea.vmem (!%p609_p6), [#allocation0], %s610_s5 }
  0x14   : > { %s97_s6 = sadd.s32 (!%p609_p6), %s752_s13, %s624_s4 }
  0x15   : > { %s611_s7 = sshll.u32 (!%p609_p6), %s97_s6, 3 }
  0x16   : > { %s99_s19 = scalar_lea.vmem %s986_s0, %s611_s7 }
  0x17   : > { %v128_v0 = vld [vmem:[%s99_s19] sm:$0xff] }
  0x18   : > { %129 = vst [vmem:[%s93_s20] sm:$0xff] %v128_v0 }
  0x19 PF: > { %p612_p7 = scmp.ge.s32.totalorder %s760_s15, 1  ;;  %p134_p8 = scmp.lt.s32.totalorder %s760_s15, 7 }
  0x1b   : > { %p135_p9 = pnand %p612_p7, %p134_p8 }
  0x1d   : > { %138 = sbr.rel (%p135_p9) target bundleno = 333 (0x14d), region = 54 }
  0x22   : > { %s141_s21 = sand.u32 1, %s604_s22   ;;  %s155_s23 = sand.u32 1, %s736_s9   ;;  %v766_v2 = vmov 0.0  }
  0x23   : > { %s613_s24 = sshll.u32 %s141_s21, 3  ;;  %s852_s25 = sshll.u32 %s155_s23, 2 }
  0x24   : > { %s164_s26 = sand.u32 7, %s744_s11   ;;  %s143_s27 = scalar_lea.vmem [#allocation0], %s613_s24 }
  0x25   : > { %v166_v1 = vld [vmem:[%s143_s27] sm:$0xff]  ;;  %s855_s28 = scalar_lea.vmem [#allocation1], %s613_s24  ;;  %s858_s3 = scalar_lea.vmem [#allocation2], %s164_s26 }
  0x26   : > { %167 = vst [vmem:[%s855_s28] sm:$0xff] %v166_v1  ;;  %s157_s22 = scalar_lea.vmem [#allocation3], %s852_s25  ;;  %s862_s4 = smov 0  }
  0x27   : > { %168 = vst [vmem:[%s858_s3] sm:$0x1] %v766_v2 }
  0x28 LB: >> { %v176_v3 = vlaneseq  ;;  %v872_v6 = vstv %s764_s4  ;;  %s208_s9 = scalar_lea.vmem %s855_s28, %s764_s4 [#allocation1]  ;;  %s336_s5 = scalar_lea.vmem [#allocation4], %s764_s4  ;;  %s764_s4 = sphi %s862_s4, %s174_s4  }
  0x29   : >> { %s353_s6 = smov [#allocation4] }
  0x2a   : >> { %v869_v5 = vshrl.u32 %v176_v3, 7 }
  0x2c   : >> { %vm180_vm0 = vcmp.gt.s32.totalorder %v869_v5, %v872_v6  ;;  %v304_v5 = vmov %v869_v5 }
  0x2d   : >> { %v175_v4 = vld [vmem:[%s855_s28] sm:$0xff]  ;;  %v882_v19 = vld [vmem:[%s208_s9] ss:$0 sm:$0xff]  ;;  %vm308_vm11 = vcmp.gt.s32.totalorder %v304_v5, %v872_v6  ;;  %vm309_vm12 = vcmp.lt.s32.totalorder %v304_v5, 8  ;;  %s301_s28 = smov %s855_s28  ;;  %v356_v5 = vmov %v869_v5 }
  0x2e   : >> { %v183_v7 = vsel %vm180_vm0, %v175_v4, 0.0  ;;  %v210_v22 = vand.u32 2147483647, %v882_v19  ;;  %vm279_vm10 = vcmp.lt.f32.partialorder %v882_v19, 0.0 }
  0x2f   : >> { %v184_v8 = vmul.f32 %v183_v7, %v183_v7 }
  0x30   : >> { %v211_v26 = vmax.f32 %v210_v22, 0.0 }
  0x31   : >> { %v185_v9 = vrot.slane %v184_v8, 4 }
  0x33   : >> { %v186_v10 = vadd.f32 %v185_v9, %v184_v8 }
  0x35   : >> { %v187_v11 = vrot.slane %v186_v10, 2 }
  0x37   : >> { %v188_v12 = vadd.f32 %v187_v11, %v186_v10 }
  0x39   : >> { %v189_v13 = vrot.slane %v188_v12, 1 }
  0x3b   : >> { %v876_v14 = vadd.f32 %v189_v13, %v188_v12 }
  0x3d   : >> { %692 = vrsqrt.f32 %v876_v14  ;;  %vm198_vm1 = vcmp.eq.f32.partialorder %v876_v14, inf  ;;  %v201_v23 = vand.u32 2147483648, %v876_v14  ;;  %vm200_vm2 = vcmp.eq.f32.partialorder %v876_v14, 0.0 }
  0x43   : >> { %v693_v15 = vpop.eup %692 }
  0x44   : >> { %v192_v16 = vmul.f32 %v693_v15, %v876_v14 }
  0x46   : >> { %v193_v17 = vmul.f32 %v693_v15, %v192_v16 }
  0x48   : >> { %v194_v18 = vmul.f32 0.5, %v193_v17  ;;  %v305_v17 = vld [vmem:[%s301_s28] sm:$0xff]  ;;  %s352_s28 = smov %s855_s28 }
  0x4a   : >> { %v195_v20 = vsub.f32 1.5, %v194_v18 }
  0x4c   : >> { %v196_v21 = vmul.f32 %v693_v15, %v195_v20 }
  0x4e   : >> { %v197_v24 = vmul.f32 %v196_v21, %v876_v14  ;;  %v330_v21 = vand.u32 127, %v176_v3 }
  0x50   : >> { %v199_v25 = vsel %vm198_vm1, %v876_v14, %v197_v24 }
  0x51   : >> { %v202_v27 = vsel %vm200_vm2, %v201_v23, %v199_v25 }
  0x52   : >> { %v212_v28 = vand.u32 2147483647, %v202_v27 }
  0x54   : >> { %v213_v29 = vmax.f32 %v211_v26, %v212_v28 }
  0x56   : >> { %694 = vrcp.f32 %v213_v29  ;;  %v225_v32 = vand.u32 2147483648, %v213_v29  ;;  %vm219_vm3 = vweird.f32 %v213_v29  ;;  %v223_v34 = vand.u32 2147483647, %v213_v29 }
  0x57   : >> { %vm264_vm9 = vcmp.eq.f32.partialorder %v213_v29, 0.0 }
  0x58   : >> { %v226_v36 = vor.u32 1.1754944e-38, %v225_v32  ;;  %vm224_vm6 = vcmp.eq.f32.partialorder %v223_v34, 8.507059e+37 }
  0x5c   : >> { %v695_v30 = vpop.eup %694 }
  0x5d   : >> { %v215_v31 = vmul.f32 %v695_v30, %v213_v29  ;;  %vm220_vm4 = vweird.f32 %v695_v30 }
  0x5e   : >> { %vm221_vm5 = vmor %vm219_vm3, %vm220_vm4 }
  0x5f   : >> { %v216_v33 = vsub.f32 1.0, %v215_v31  ;;  %vm310_vm3 = vmand %vm308_vm11, %vm309_vm12 }
  0x60   : >> { %v311_v25 = vsel %vm310_vm3, %v305_v17, 0.0 }
  0x61   : >> { %v217_v35 = vmul.f32 %v695_v30, %v216_v33 }
  0x63   : >> { %v218_v37 = vadd.f32 %v695_v30, %v217_v35 }
  0x65   : >> { %v222_v38 = vsel %vm221_vm5, %v695_v30, %v218_v37  ;;  %v349_v37 = vld [vmem:[%s858_s3] ss:$0 sm:$0xff] }
  0x66   : >> { %v227_v39 = vsel %vm224_vm6, %v226_v36, %v222_v38  ;;  %v767_v36 = vmov 1.0   ;;  %v359_v38 = vld [vmem:[%s352_s28] sm:$0xff]  ;;  %s369_s28 = smov %s352_s28 }
  0x67   : >> { %v228_v40 = vmul.f32 %v227_v39, %v210_v22  ;;  %v244_v41 = vmul.f32 0.0, %v227_v39  ;;  %v261_v42 = vmul.f32 %v227_v39, %v212_v28  ;;  %s394_s7 = scalar_lea.vmem %s369_s28, %s764_s4  ;;  %s174_s4 = sadd.s32 1, %s764_s4  }
  0x68   : >> { %p171_p10 = scmp.ge.s32.totalorder %s174_s4, 4  }
  0x69   : >> { %v229_v43 = vmul.f32 %v228_v40, %v228_v40  ;;  %v245_v44 = vmul.f32 %v244_v41, %v244_v41  ;;  %v262_v45 = vmul.f32 %v261_v42, %v261_v42  ;;  %s625_s8 = smul.u32 (%p171_p10), 3, %s748_s12 }
  0x6b   : >> { %v246_v46 = vadd.f32 %v245_v44, %v229_v43  ;;  %s419_s18 = sadd.s32 (%p171_p10), %s744_s11, %s625_s8 }
  0x6c   : > { %s619_s19 = sshll.u32 (%p171_p10), %s419_s18, 3 }
  0x6d   : >> { %v263_v47 = vadd.f32 %v262_v45, %v246_v46  ;;  %s421_s23 = scalar_lea.vmem (%p171_p10), %s987_s1, %s619_s19 }
  0x6f   : >> { %696 = vrsqrt.f32 %v263_v47  ;;  %vm272_vm7 = vcmp.eq.f32.partialorder %v263_v47, inf  ;;  %v275_v54 = vand.u32 2147483648, %v263_v47  ;;  %vm274_vm8 = vcmp.eq.f32.partialorder %v263_v47, 0.0 }
  0x75   : >> { %v697_v48 = vpop.eup %696 }
  0x76   : >> { %v266_v49 = vmul.f32 %v697_v48, %v263_v47 }
  0x78   : >> { %v267_v50 = vmul.f32 %v697_v48, %v266_v49 }
  0x7a   : >> { %v268_v51 = vmul.f32 0.5, %v267_v50 }
  0x7c   : >> { %v269_v52 = vsub.f32 1.5, %v268_v51  ;;  %v380_v51 = vld [vmem:[%s369_s28] sm:$0xff] }
  0x7e   : >> { %v270_v53 = vmul.f32 %v697_v48, %v269_v52 }
  0x80   : >> { %v271_v55 = vmul.f32 %v270_v53, %v263_v47 }
  0x82   : >> { %v273_v56 = vsel %vm272_vm7, %v263_v47, %v271_v55  ;;  %vm915_vm7 = vcmp.eq.s32.totalorder %v330_v21, %v872_v6 }
  0x83   : >> { %v276_v57 = vsel %vm274_vm8, %v275_v54, %v273_v56  ;;  %vm361_vm8 = vcmp.lt.s32.totalorder %v356_v5, 8  ;;  %v373_v5 = vmov %v869_v5 }
  0x84   : >> { %v277_v58 = vmul.f32 %v276_v57, %v213_v29 }
  0x86   : >> { %v278_v59 = vsel %vm264_vm9, 0.0, %v277_v58  ;;  %vm382_vm9 = vcmp.gt.s32.totalorder %v330_v21, %v872_v6 }
  0x87   : >> { %v280_v60 = vxor.u32 2147483648, %v278_v59 }
  0x89   : >> { %v281_v61 = vsel %vm279_vm10, %v278_v59, %v280_v60 }
  0x8a   : >> { %v896_v62 = vsel %vm200_vm2, %v882_v19, %v281_v61  ;;  %698 = vrcp.f32 %v281_v61  ;;  %vm288_vm13 = vweird.f32 %v281_v61  ;;  %v292_v10 = vand.u32 2147483647, %v281_v61 }
  0x8b   : >> { %v300_v63 = vsub.f32 %v882_v19, %v896_v62  ;;  %v294_v11 = vand.u32 2147483648, %v281_v61  ;;  %v282_v27 = vsub.f32 %v281_v61, %v882_v19 }
  0x8c   : >> { %vm293_vm6 = vcmp.eq.f32.partialorder %v292_v10, 8.507059e+37 }
  0x8d   : >> { %700 = vrcp.f32 %v300_v63  ;;  %v323_v8 = vand.u32 2147483648, %v300_v63  ;;  %vm317_vm15 = vweird.f32 %v300_v63  ;;  %v321_v13 = vand.u32 2147483647, %v300_v63 }
  0x8e   : >> { %v295_v22 = vor.u32 1.1754944e-38, %v294_v11 }
  0x8f   : >> { %v324_v20 = vor.u32 1.1754944e-38, %v323_v8  ;;  %vm322_vm5 = vcmp.eq.f32.partialorder %v321_v13, 8.507059e+37 }
  0x90   : >> { %v699_v0 = vpop.eup %698 }
  0x91   : >> { %v284_v1 = vmul.f32 %v699_v0, %v281_v61  ;;  %vm289_vm14 = vweird.f32 %v699_v0 }
  0x92   : >> { %vm903_vm1 = vmor %vm288_vm13, %vm289_vm14 }
  0x93   : >> { %v701_v2 = vpop.eup %700  ;;  %v285_v4 = vsub.f32 1.0, %v284_v1 }
  0x94   : >> { %v313_v7 = vmul.f32 %v701_v2, %v300_v63  ;;  %vm318_vm0 = vweird.f32 %v701_v2 }
  0x95   : >> { %v286_v9 = vmul.f32 %v699_v0, %v285_v4  ;;  %vm319_vm4 = vmor %vm317_vm15, %vm318_vm0 }
  0x96   : >> { %v314_v12 = vsub.f32 1.0, %v313_v7 }
  0x97   : >> { %v287_v15 = vadd.f32 %v699_v0, %v286_v9 }
  0x98   : >> { %v315_v18 = vmul.f32 %v701_v2, %v314_v12 }
  0x99   : >> { %v291_v24 = vsel %vm903_vm1, %v699_v0, %v287_v15 }
  0x9a   : >> { %v316_v23 = vadd.f32 %v701_v2, %v315_v18  ;;  %v296_v29 = vsel %vm293_vm6, %v295_v22, %v291_v24 }
  0x9b   : >> { %v297_v32 = vmul.f32 %v296_v29, %v282_v27 }
  0x9c   : >> { %v320_v26 = vsel %vm319_vm4, %v701_v2, %v316_v23 }
  0x9d   : >> { %v325_v28 = vsel %vm322_vm5, %v324_v20, %v320_v26  ;;  %v299_v19 = vsel %vm200_vm2, 0.0, %v297_v32 }
  0x9e   : >> { %v326_v30 = vmul.f32 %v325_v28, %v311_v25  ;;  %v342_v34 = vsel %vm915_vm7, %v299_v19, 0.0 }
  0xa0   : >> { %v327_v31 = vsel %vm200_vm2, 0.0, %v326_v30  ;;  %vm390_vm2 = vcmp.ge.s32.totalorder %v373_v5, %v872_v6 }
  0xa1   : >> { %v332_v33 = vsel %vm915_vm7, %v327_v31, 0.0  ;;  %vm391_vm10 = vmand %vm915_vm7, %vm390_vm2 }
  0xa2   : >> { %333 = vadd.xlane.f32.xlu0 %v332_v33 }
  0xaa   : >> { %343 = vadd.xlane.f32.xlu0 %v342_v34 }
 0x115   : >> { %v334_v35 = vpop.xlane.xlu0 %333 }
 0x116   : >> { %335 = vst [vmem:[#allocation4] sm:$0xff] %v334_v35 }
 0x117   : >> { %337 = vst [vmem:[%s336_s5] sm:$0x1] %v767_v36 }
 0x11d   : >> { %v344_v39 = vpop.xlane.xlu0 %343 }
 0x11e   : >> { %v358_v40 = vld [vmem:[%s353_s6] sm:$0xff]  ;;  %v350_v14 = vsel %vm915_vm7, %v344_v39, %v349_v37  ;;  %s370_s6 = smov %s353_s6 }
 0x11f   : >> { %v360_v41 = vmul.f32 %v359_v38, %v358_v40  ;;  %351 = vst [vmem:[%s858_s3] sm:$0x1] %v350_v14  ;;  %v378_v50 = vld [vmem:[%s370_s6] sm:$0xff] }
 0x121   : >> { %v362_v42 = vsel %vm361_vm8, %v360_v41, 0.0 }
 0x122   : >> { %v363_v43 = vrot.slane %v362_v42, 4 }
 0x124   : >> { %v364_v44 = vadd.f32 %v363_v43, %v362_v42 }
 0x126   : >> { %v365_v45 = vrot.slane %v364_v44, 2  ;;  %v404_v5 = vld [vmem:[#allocation2] sm:$0xf] (%p171_p10) }
 0x127   : > { %407 = vst [vmem:[%s157_s22] sm:$0xf] (%p171_p10), %v404_v5 }
 0x128   : >> { %v366_v46 = vadd.f32 %v365_v45, %v364_v44 }
 0x12a   : >> { %v367_v47 = vrot.slane %v366_v46, 1 }
 0x12c   : >> { %v368_v48 = vadd.f32 %v367_v47, %v366_v46 }
 0x12e   : >> { %v374_v49 = vmul.f32 %v368_v48, %v344_v39 }
 0x130   : >> { %v379_v52 = vmul.f32 %v378_v50, %v374_v49 }
 0x132   : >> { %v383_v53 = vsub.f32 %v380_v51, %v379_v52 }
 0x134   : >> { %v384_v54 = vsel %vm382_vm9, %v383_v53, %v380_v51 }
 0x135   : >> { %v392_v55 = vsel %vm391_vm10, %v378_v50, %v384_v54 }
 0x136   : >> { %393 = vst [vmem:[%s369_s28] sm:$0xff] %v392_v55 }
 0x13b   : > { %173 = sbr.rel (!%p171_p10) target bundleno = 40 (0x28), region = 175 }
 0x13d   : >> { %v395_v56 = vld [vmem:[%s394_s7] ss:$0 sm:$0xff] }
 0x13e   : >> { %v400_v57 = vsel %vm915_vm7, %v896_v62, %v395_v56 }
 0x13f   : >> { %401 = vst [vmem:[%s394_s7] sm:$0x1] %v400_v57 }
 0x140   : > { %p458_p11 = scmp.lt.s32.totalorder (%p835_p4), %s744_s11, 0  ;;  %s459_s24 = ssub.s32 (%p835_p4), 0, %s744_s11  ;;  %v483_v58 = vld [vmem:[%s157_s22] sm:$0xf] (%p835_p4) }
 0x141   : > { %s620_s26 = smin.u32 (%p835_p4), %s744_s11, %s459_s24 }
 0x142   : > { %s461_s27 = sshrl.u32 (%p835_p4), %s620_s26, 3 }
 0x143   : > { %457 = sbr.rel (!%p835_p4) target bundleno = 333 (0x14d), region = 99  ;;  %s462_s3 = ssub.s32 (%p835_p4), 0, %s461_s27 }
 0x146   : > { %v450_v6 = vld [vmem:[%s855_s28] sm:$0xff] }
 0x147   : > { %451 = vst [vmem:[%s421_s23] sm:$0xff] %v450_v6 }
 0x148   : > { %s1007_s3 = smov (!%p458_p11, %s462_s3), %s461_s27 }
 0x149   : > { %s464_s28 = sadd.s32 %s748_s12, %s1007_s3 }
 0x14a   : > { %s621_s4 = sshll.u32 %s464_s28, 2 }
 0x14b   : > { %s466_s29 = scalar_lea.vmem %s988_s2, %s621_s4 }
 0x14c   : > { %484 = vst [vmem:[%s466_s29] sm:$0xf] %v483_v58 }
 0x14d PF: > { %s9_s15 = sadd.s32 1, %s760_s15   ;;  %s994_s9 = smov %s740_s10 }
 0x14e   : > { %p6_p12 = scmp.ge.s32.totalorder %s9_s15, 8   ;;  %s995_s10 = smov %s840_s30 }
 0x14f   : > { %s996_s11 = smov %s752_s13  ;;  %s997_s12 = smov %s756_s14 }
 0x150   : > { %s998_s13 = smov %s1001_s16  ;;  %s999_s14 = smov %s1005_s17 }
 0x151   :  { %8 = sbr.rel (!%p6_p12) target bundleno = 4 (0x4), region = 186 }

// kernel: _lambda_.1
= control target key start
LH: loop header
LB: loop body
LE: loop exit
PB: predicated region body
PF: predicated region fallthrough
CT: control target
= control target key end

     0   :  { %7 = vsyncpa [#allocation3], 0  ;;  %s99_s12 = smov [#allocation2]   ;;  %s100_s14 = smov 128   ;;  %s126_s0 = inlined_call_operand.vmem [shape: f32[8,128], index: 0, kind: input, shape index: {}]   ;;  %s127_s1 = inlined_call_operand.hbm [shape: f32[128,128], index: 1, kind: input, shape index: {}]   ;;  %s128_s2 = inlined_call_operand.vmem [shape: f32[8,128], index: 2, kind: output, shape index: {}]  }
   0x1   :  { %s14_s11 = sshll.u32 %s127_s1, 4  ;;  %s16_s13 = sshll.u32 %s99_s12, 4  ;;  %s15_s11 = int_to_ptr.hbm [resolvable:$true] %s14_s11  ;;  %s17_s13 = int_to_ptr.vmem [resolvable:$true] %s16_s13 }
   0x2   :  { %s101_s15 = smov 8  }
   0x3   :  { %22 = dma.hbm_to_vmem [thread:$0]  %s15_s11, 2048, %s17_s13, [#allocation3], %s100_s14, %s100_s14, %s101_s15  }
   0x4   :  { %97 = dma.done.wait [#allocation3], 2048  }
   0x5   :  { %98 = vsyncadd [#allocation3], 4294965248  ;;  %v43_v0 = vld [vmem:[#allocation2 + $0x78] sm:$0xff]  ;;  %v42_v1 = vld [vmem:[#allocation2 + $0x70] sm:$0xff] }
   0x6   :  { %44 = vmatpush.msra.mxu0 %v43_v0  ;;  %v41_v2 = vld [vmem:[#allocation2 + $0x68] sm:$0xff]  ;;  %v40_v3 = vld [vmem:[#allocation2 + $0x60] sm:$0xff]  ;;  %v39_v4 = vld [vmem:[#allocation2 + $0x58] sm:$0xff] }
   0x7   :  { %v38_v5 = vld [vmem:[#allocation2 + $0x50] sm:$0xff]  ;;  %v37_v6 = vld [vmem:[#allocation2 + $0x48] sm:$0xff]  ;;  %v36_v7 = vld [vmem:[#allocation2 + $0x40] sm:$0xff] }
   0x8   :  { %45 = vmatpush.msra.mxu0 %v42_v1  ;;  %v35_v8 = vld [vmem:[#allocation2 + $0x38] sm:$0xff]  ;;  %v34_v9 = vld [vmem:[#allocation2 + $0x30] sm:$0xff]  ;;  %v33_v10 = vld [vmem:[#allocation2 + $0x28] sm:$0xff] }
   0x9   :  { %v32_v11 = vld [vmem:[#allocation2 + $0x20] sm:$0xff]  ;;  %v31_v12 = vld [vmem:[#allocation2 + $0x18] sm:$0xff]  ;;  %v30_v13 = vld [vmem:[#allocation2 + $0x10] sm:$0xff] }
   0xa   :  { %46 = vmatpush.msra.mxu0 %v41_v2  ;;  %v29_v14 = vld [vmem:[#allocation2 + $0x8] sm:$0xff]  ;;  %v28_v15 = vld [vmem:[#allocation2] sm:$0xff] }
   0xb   :  { %v27_v16 = vld [vmem:[%s126_s0] sm:$0xff] }
   0xc   :  { %47 = vmatpush.msra.mxu0 %v40_v3 }
   0xe   :  { %48 = vmatpush.msra.mxu0 %v39_v4 }
  0x10   :  { %49 = vmatpush.msra.mxu0 %v38_v5 }
  0x12   :  { %50 = vmatpush.msra.mxu0 %v37_v6 }
  0x14   :  { %51 = vmatpush.msra.mxu0 %v36_v7 }
  0x16   :  { %52 = vmatpush.msra.mxu0 %v35_v8 }
  0x18   :  { %53 = vmatpush.msra.mxu0 %v34_v9 }
  0x1a   :  { %54 = vmatpush.msra.mxu0 %v33_v10 }
  0x1c   :  { %55 = vmatpush.msra.mxu0 %v32_v11 }
  0x1e   :  { %56 = vmatpush.msra.mxu0 %v31_v12 }
  0x20   :  { %57 = vmatpush.msra.mxu0 %v30_v13 }
  0x22   :  { %58 = vmatpush.msra.mxu0 %v29_v14 }
  0x24   :  { %59 = vmatpush.msra.mxu0 %v28_v15 }
  0x25   :  { %60 = vmatmul.f32.vlgmr.msra.gmra.mxu0 %v27_v16 }
  0xa2   :  { %v61_v17 = vpop.f32.mrf.mxu0 }
  0xa3   :  { %64 = vst [vmem:[%s128_s2] sm:$0xff] %v61_v17 }
  0xa4   :  { %69 = vsyncpa [#allocation3], 1 }

// kernel: custom-call.56
= control target key start
LH: loop header
LB: loop body
LE: loop exit
PB: predicated region body
PF: predicated region fallthrough
CT: control target
= control target key end

     0   :  { %s349_s6 = smov 0   ;;  %s351_s7 = smov 0   ;;  %s421_s0 = inlined_call_operand.vmem [shape: f32[2,3,4,4], index: 0, kind: input, shape index: {}]   ;;  %s422_s1 = inlined_call_operand.vmem [shape: f32[2,3,4,4], index: 1, kind: output, shape index: {}]  }
   0x1   :  { %s353_s8 = smov 0   ;;  %s355_s9 = smov 0  }
   0x2   :  { %s357_s10 = smov 0  }
   0x3 LB: > { %s245_s11 = sadd.s32 4294967295, %s337_s10   ;;  %s16_s12 = sadd.s32 1, %s329_s8  ;;  %s337_s10 = sphi %s357_s10, %s7_s10   ;;  %s333_s9 = sphi %s355_s9, %s426_s9   ;;  %s329_s8 = sphi %s353_s8, %s425_s8   ;;  %s325_s7 = sphi %s351_s7, %s424_s7   ;;  %s321_s6 = sphi %s349_s6, %s423_s6  }
   0x4   : > { %p17_p0 = scmp.ge.s32.totalorder %s16_s12, 3  ;;  %s19_s13 = sadd.s32 1, %s333_s9 }
   0x5   : > { %p247_p2 = scmp.ge.s32.totalorder %s337_s10, 6 }
   0x6   : > { %s428_s12 = smov (%p17_p0, %s16_s12), 0  ;;  %s430_s13 = smov (!%p17_p0, %s19_s13), %s333_s9 }
   0x7   : > { %p21_p1 = scmp.ge.s32.totalorder %s430_s13, 2  ;;  %33 = sbr.rel (%p247_p2) target bundleno = 15 (0xf), region = 16 }
   0x8   : > { %s35_s14 = sand.u32 (!%p247_p2), 1, %s337_s10   ;;  %s257_s15 = smul.u32 (!%p247_p2), 3, %s333_s9 }
   0x9   : > { %s432_s13 = smov (%p21_p1, %s430_s13), 0  ;;  %s248_s16 = sshll.u32 (!%p247_p2), %s35_s14, 2 }
   0xa   : > { %s39_s17 = sadd.s32 (!%p247_p2), %s329_s8, %s257_s15  ;;  %s37_s22 = scalar_lea.vmem (!%p247_p2), [#allocation1], %s248_s16 }
   0xb   : > { %s249_s18 = sshll.u32 (!%p247_p2), %s39_s17, 2 }
   0xc   : > { %s41_s21 = scalar_lea.vmem %s421_s0, %s249_s18 }
   0xd   : > { %v58_v0 = vld [vmem:[%s41_s21] sm:$0xf] }
   0xe   : > { %59 = vst [vmem:[%s37_s22] sm:$0xf] %v58_v0 }
   0xf PF: > { %p250_p3 = scmp.ge.s32.totalorder %s337_s10, 1  ;;  %p76_p4 = scmp.lt.s32.totalorder %s337_s10, 7 }
  0x11   : > { %p77_p5 = pnand %p250_p3, %p76_p4 }
  0x12   : > { %s391_s23 = sand.u32 (!%p77_p5), 1, %s245_s11   ;;  %s258_s26 = smul.u32 (!%p77_p5), 3, %s325_s7 }
  0x13   : > { %80 = sbr.rel (%p77_p5) target bundleno = 409 (0x199), region = 50  ;;  %s251_s24 = sshll.u32 (!%p77_p5), %s391_s23, 2 }
  0x14   : > { %s89_s25 = scalar_lea.vmem (!%p77_p5), [#allocation1], %s251_s24  ;;  %s155_s27 = sadd.s32 (!%p77_p5), %s321_s6, %s258_s26 }
  0x15   : > { %s93_s28 = scalar_lea.vmem (!%p77_p5), [#allocation3], %s251_s24  ;;  %s254_s29 = sshll.u32 (!%p77_p5), %s155_s27, 2 }
  0x16   : > { %s157_s3 = scalar_lea.vmem (!%p77_p5), %s422_s1, %s254_s29 }
  0x18   : > { %v98_v1 = vlaneseq  ;;  %v96_v2 = vld [vmem:[%s89_s25] sm:$0xf]  ;;  %vm112_vm1 = vcmask 31744  }
  0x19   : > { %97 = vst [vmem:[#allocation0] sm:$0xf] %v96_v2 }
  0x1a   : > { %v99_v3 = vand.u32 127, %v98_v1  ;;  %v101_v4 = vshrl.u32 %v98_v1, 7 }
  0x1c   : > { %vm107_vm0 = vcmp.eq.s32.totalorder %v99_v3, 0  ;;  %vm103_vm2 = vcmp.eq.s32.totalorder %v99_v3, %v101_v4  ;;  %vm116_vm3 = vcmp.eq.s32.totalorder %v99_v3, 1  ;;  %vm127_vm4 = vcmp.eq.s32.totalorder %v99_v3, 2 }
  0x1d   : > { %vm138_vm5 = vcmp.eq.s32.totalorder %v99_v3, 3 }
  0x20   : > { %v104_v5 = vld [vmem:[#allocation0] sm:$0xff] }
  0x21   : > { %v111_v6 = vld [vmem:[#allocation0 + $0x1] ss:$0 sm:$0xff]  ;;  %v108_v7 = vsel %vm107_vm0, %v104_v5, 1.0  ;;  %v122_v11 = vld [vmem:[#allocation0 + $0x2] ss:$0 sm:$0xff] }
  0x22   : > { %v113_v8 = vsel %vm112_vm1, %v111_v6, 0.0  ;;  %v109_v9 = vsel %vm103_vm2, %v108_v7, 0.0  ;;  %v124_v12 = vsel %vm112_vm1, %v122_v11, 0.0  ;;  %v133_v16 = vld [vmem:[#allocation0 + $0x3] ss:$0 sm:$0xff] }
  0x23   : > { %v117_v10 = vmul.f32 %v113_v8, %v109_v9  ;;  %v135_v17 = vsel %vm112_vm1, %v133_v16, 0.0 }
  0x25   : > { %118 = vadd.xlane.f32.xlu0 %v117_v10 }
  0x98   : > { %v119_v13 = vpop.xlane.xlu0 %118 }
  0x99   : > { %v120_v14 = vsel %vm116_vm3, %v119_v13, %v109_v9 }
  0x9a   : > { %v128_v15 = vmul.f32 %v124_v12, %v120_v14 }
  0x9c   : > { %129 = vadd.xlane.f32.xlu0 %v128_v15 }
 0x10f   : > { %v130_v18 = vpop.xlane.xlu0 %129 }
 0x110   : > { %v131_v19 = vsel %vm127_vm4, %v130_v18, %v120_v14 }
 0x111   : > { %v139_v20 = vmul.f32 %v135_v17, %v131_v19 }
 0x113   : > { %140 = vadd.xlane.f32.xlu1 %v139_v20 }
 0x186   : > { %v141_v21 = vpop.xlane.xlu1 %140 }
 0x187   : > { %v142_v22 = vsel %vm138_vm5, %v141_v21, %v131_v19 }
 0x188   : > { %143 = vst [vmem:[#allocation2] sm:$0xff] %v142_v22 }
 0x18f   : > { %v146_v23 = vld [vmem:[#allocation2] sm:$0xf] }
 0x190   : > { %149 = vst [vmem:[%s93_s28] sm:$0xf] %v146_v23 }
 0x197   : > { %v174_v24 = vld [vmem:[%s93_s28] sm:$0xf] }
 0x198   : > { %175 = vst [vmem:[%s157_s3] sm:$0xf] %v174_v24 }
 0x199 PF: > { %s7_s10 = sadd.s32 1, %s337_s10   ;;  %s423_s6 = smov %s329_s8 }
 0x19a   : > { %p4_p6 = scmp.ge.s32.totalorder %s7_s10, 8   ;;  %s424_s7 = smov %s333_s9 }
 0x19b   : > { %s425_s8 = smov %s428_s12  ;;  %s426_s9 = smov %s432_s13 }
 0x19c   :  { %6 = sbr.rel (!%p4_p6) target bundleno = 3 (0x3), region = 113 }

// kernel: custom-call.48
= control target key start
LH: loop header
LB: loop body
LE: loop exit
PB: predicated region body
PF: predicated region fallthrough
CT: control target
= control target key end

     0   :  { %s6_s0 = inlined_call_operand.hbm [shape: pred[2,3], index: 0, kind: output, shape index: {}]  }

// kernel: custom-call.53
= control target key start
LH: loop header
LB: loop body
LE: loop exit
PB: predicated region body
PF: predicated region fallthrough
CT: control target
= control target key end

     0   :  { %s462_s6 = smov 0   ;;  %s464_s7 = smov 0   ;;  %s539_s0 = inlined_call_operand.vmem [shape: f32[2,3,4,4], index: 0, kind: input, shape index: {}]   ;;  %s540_s1 = inlined_call_operand.vmem [shape: f32[2,3,4,4], index: 1, kind: output, shape index: {}]  }
   0x1   :  { %s466_s8 = smov 0   ;;  %s468_s9 = smov 0  }
   0x2   :  { %s470_s10 = smov 0  }
   0x3 LB: > { %s348_s11 = sadd.s32 4294967295, %s449_s10   ;;  %s29_s12 = sadd.s32 1, %s441_s8  ;;  %s449_s10 = sphi %s470_s10, %s7_s10   ;;  %s445_s9 = sphi %s468_s9, %s544_s9   ;;  %s441_s8 = sphi %s466_s8, %s543_s8   ;;  %s437_s7 = sphi %s464_s7, %s542_s7   ;;  %s433_s6 = sphi %s462_s6, %s541_s6  }
   0x4   : > { %p31_p0 = scmp.ge.s32.totalorder %s29_s12, 3  ;;  %s33_s13 = sadd.s32 1, %s445_s9 }
   0x5   : > { %p350_p2 = scmp.ge.s32.totalorder %s449_s10, 6 }
   0x6   : > { %s546_s12 = smov (%p31_p0, %s29_s12), 0  ;;  %s548_s13 = smov (!%p31_p0, %s33_s13), %s445_s9 }
   0x7   : > { %p35_p1 = scmp.ge.s32.totalorder %s548_s13, 2  ;;  %47 = sbr.rel (%p350_p2) target bundleno = 15 (0xf), region = 16 }
   0x8   : > { %s49_s14 = sand.u32 (!%p350_p2), 1, %s449_s10   ;;  %s360_s15 = smul.u32 (!%p350_p2), 3, %s445_s9 }
   0x9   : > { %s550_s13 = smov (%p35_p1, %s548_s13), 0  ;;  %s351_s16 = sshll.u32 (!%p350_p2), %s49_s14, 2 }
   0xa   : > { %s55_s17 = sadd.s32 (!%p350_p2), %s441_s8, %s360_s15  ;;  %s51_s22 = scalar_lea.vmem (!%p350_p2), [#allocation1], %s351_s16 }
   0xb   : > { %s352_s18 = sshll.u32 (!%p350_p2), %s55_s17, 2 }
   0xc   : > { %s57_s21 = scalar_lea.vmem %s539_s0, %s352_s18 }
   0xd   : > { %v74_v0 = vld [vmem:[%s57_s21] sm:$0xf] }
   0xe   : > { %75 = vst [vmem:[%s51_s22] sm:$0xf] %v74_v0 }
   0xf PF: > { %p353_p3 = scmp.ge.s32.totalorder %s449_s10, 1  ;;  %p92_p4 = scmp.lt.s32.totalorder %s449_s10, 7 }
  0x11   : > { %p93_p5 = pnand %p353_p3, %p92_p4 }
  0x12   : > { %s506_s23 = sand.u32 (!%p93_p5), 1, %s348_s11   ;;  %s361_s26 = smul.u32 (!%p93_p5), 3, %s437_s7 }
  0x13   : > { %96 = sbr.rel (%p93_p5) target bundleno = 644 (0x284), region = 50  ;;  %s354_s24 = sshll.u32 (!%p93_p5), %s506_s23, 2 }
  0x14   : > { %s105_s25 = scalar_lea.vmem (!%p93_p5), [#allocation1], %s354_s24  ;;  %s248_s27 = sadd.s32 (!%p93_p5), %s433_s6, %s361_s26 }
  0x15   : > { %s109_s28 = scalar_lea.vmem (!%p93_p5), [#allocation3], %s354_s24  ;;  %s357_s29 = sshll.u32 (!%p93_p5), %s248_s27, 2 }
  0x16   : > { %s250_s3 = scalar_lea.vmem (!%p93_p5), %s540_s1, %s357_s29 }
  0x18   : > { %v451_v1 = vmov 0.0   ;;  %v112_v5 = vld [vmem:[%s105_s25] sm:$0xf]  ;;  %vm115_vm3 = vcmask 7168   ;;  %vm142_vm5 = vcmask 15368   ;;  %vm168_vm6 = vcmask 1047553  }
  0x19   : > { %114 = vst [vmem:[#allocation2] sm:$0xff] %v451_v1  ;;  %vm169_vm9 = vmand %vm142_vm5, %vm168_vm6  ;;  %vm173_vm11 = vcmask 23568   ;;  %vm199_vm12 = vcmask 1047554  }
  0x1a   : > { %113 = vst [vmem:[#allocation0] sm:$0xf] %v112_v5  ;;  %vm200_vm15 = vmand %vm173_vm11, %vm199_vm12 }
  0x20   : > { %v116_v2 = vld [vmem:[#allocation2] ss:$0 sm:$0xff] }
  0x21   : > { %v118_v3 = vmul.f32 %v116_v2, %v116_v2  ;;  %v134_v4 = vmul.f32 0.0, %v116_v2  ;;  %v117_v6 = vld [vmem:[#allocation0] ss:$0 sm:$0xff]  ;;  %v146_v24 = vld [vmem:[#allocation0 + $0x1] ss:$0 sm:$0xff] }
  0x22   : > { %v511_v14 = vld [vmem:[#allocation0] sm:$0xff] }
  0x23   : > { %119 = vadd.xlane.f32.xlu0 %v118_v3  ;;  %v177_v42 = vld [vmem:[#allocation0 + $0x2] ss:$0 sm:$0xff]  ;;  %v208_v60 = vld [vmem:[#allocation0 + $0x3] ss:$0 sm:$0xff] }
  0x2b   : > { %135 = vadd.xlane.f32.xlu0 %v134_v4 }
  0x96   : > { %v120_v7 = vpop.xlane.xlu0 %119 }
  0x97   : > { %v121_v8 = vsub.f32 %v117_v6, %v120_v7 }
  0x99   : > { %403 = vrsqrt.f32 %v121_v8  ;;  %vm128_vm1 = vweird.f32 %v121_v8 }
  0x9e   : > { %v136_v13 = vpop.xlane.xlu0 %135 }
  0x9f   : > { %v404_v9 = vpop.eup %403  ;;  %v137_v16 = vsub.f32 %v511_v14, %v136_v13 }
  0xa0   : > { %v123_v10 = vmul.f32 %v404_v9, %v121_v8  ;;  %vm129_vm0 = vweird.f32 %v404_v9 }
  0xa1   : > { %vm130_vm2 = vmor %vm128_vm1, %vm129_vm0  ;;  %vm204_vm1 = vcmask 31768  }
  0xa2   : > { %v124_v11 = vmul.f32 %v404_v9, %v123_v10 }
  0xa4   : > { %v125_v12 = vmul.f32 0.5, %v124_v11 }
  0xa6   : > { %v126_v15 = vsub.f32 1.5, %v125_v12 }
  0xa8   : > { %v127_v17 = vmul.f32 %v404_v9, %v126_v15 }
  0xaa   : > { %v131_v18 = vsel %vm130_vm2, %v404_v9, %v127_v17  ;;  %vm230_vm2 = vcmask 1047555  }
  0xab   : > { %v138_v19 = vmul.f32 %v137_v16, %v131_v18  ;;  %vm231_vm5 = vmand %vm204_vm1, %vm230_vm2 }
  0xad   : > { %v139_v20 = vsel %vm115_vm3, %v138_v19, 0.0 }
  0xae   : > { %141 = vst [vmem:[#allocation2] sm:$0xff] %v139_v20 }
  0xb5   : > { %v144_v21 = vld [vmem:[#allocation2 + $0x1] ss:$0 sm:$0xff] }
  0xb6   : > { %v147_v22 = vmul.f32 %v144_v21, %v144_v21  ;;  %v163_v23 = vmul.f32 %v144_v21, %v139_v20 }
  0xb8   : > { %148 = vadd.xlane.f32.xlu1 %v147_v22 }
  0xc0   : > { %164 = vadd.xlane.f32.xlu1 %v163_v23 }
 0x12b   : > { %v149_v25 = vpop.xlane.xlu1 %148 }
 0x12c   : > { %v150_v26 = vsub.f32 %v146_v24, %v149_v25 }
 0x12e   : > { %405 = vrsqrt.f32 %v150_v26  ;;  %vm157_vm7 = vweird.f32 %v150_v26 }
 0x133   : > { %v165_v32 = vpop.xlane.xlu1 %164 }
 0x134   : > { %v406_v27 = vpop.eup %405  ;;  %v166_v34 = vsub.f32 %v511_v14, %v165_v32 }
 0x135   : > { %v152_v28 = vmul.f32 %v406_v27, %v150_v26  ;;  %vm158_vm4 = vweird.f32 %v406_v27 }
 0x136   : > { %vm159_vm8 = vmor %vm157_vm7, %vm158_vm4 }
 0x137   : > { %v153_v29 = vmul.f32 %v406_v27, %v152_v28 }
 0x139   : > { %v154_v30 = vmul.f32 0.5, %v153_v29 }
 0x13b   : > { %v155_v31 = vsub.f32 1.5, %v154_v30 }
 0x13d   : > { %v156_v33 = vmul.f32 %v406_v27, %v155_v31 }
 0x13f   : > { %v160_v35 = vsel %vm159_vm8, %v406_v27, %v156_v33 }
 0x140   : > { %v167_v36 = vmul.f32 %v166_v34, %v160_v35 }
 0x142   : > { %v170_v37 = vsel %vm169_vm9, %v167_v36, 0.0 }
 0x143   : > { %v171_v38 = vadd.f32 %v170_v37, %v139_v20 }
 0x145   : > { %172 = vst [vmem:[#allocation2] sm:$0xff] %v171_v38 }
 0x14c   : > { %v175_v39 = vld [vmem:[#allocation2 + $0x2] ss:$0 sm:$0xff] }
 0x14d   : > { %v178_v40 = vmul.f32 %v175_v39, %v175_v39  ;;  %v194_v41 = vmul.f32 %v175_v39, %v171_v38 }
 0x14f   : > { %179 = vadd.xlane.f32.xlu2 %v178_v40 }
 0x157   : > { %195 = vadd.xlane.f32.xlu2 %v194_v41 }
 0x1c2   : > { %v180_v43 = vpop.xlane.xlu2 %179 }
 0x1c3   : > { %v181_v44 = vsub.f32 %v177_v42, %v180_v43 }
 0x1c5   : > { %407 = vrsqrt.f32 %v181_v44  ;;  %vm188_vm13 = vweird.f32 %v181_v44 }
 0x1ca   : > { %v196_v50 = vpop.xlane.xlu2 %195 }
 0x1cb   : > { %v408_v45 = vpop.eup %407  ;;  %v197_v52 = vsub.f32 %v511_v14, %v196_v50 }
 0x1cc   : > { %v183_v46 = vmul.f32 %v408_v45, %v181_v44  ;;  %vm189_vm10 = vweird.f32 %v408_v45 }
 0x1cd   : > { %vm190_vm14 = vmor %vm188_vm13, %vm189_vm10 }
 0x1ce   : > { %v184_v47 = vmul.f32 %v408_v45, %v183_v46 }
 0x1d0   : > { %v185_v48 = vmul.f32 0.5, %v184_v47 }
 0x1d2   : > { %v186_v49 = vsub.f32 1.5, %v185_v48 }
 0x1d4   : > { %v187_v51 = vmul.f32 %v408_v45, %v186_v49 }
 0x1d6   : > { %v191_v53 = vsel %vm190_vm14, %v408_v45, %v187_v51 }
 0x1d7   : > { %v198_v54 = vmul.f32 %v197_v52, %v191_v53 }
 0x1d9   : > { %v201_v55 = vsel %vm200_vm15, %v198_v54, 0.0 }
 0x1da   : > { %v202_v56 = vadd.f32 %v201_v55, %v171_v38 }
 0x1dc   : > { %203 = vst [vmem:[#allocation2] sm:$0xff] %v202_v56 }
 0x1e3   : > { %v206_v57 = vld [vmem:[#allocation2 + $0x3] ss:$0 sm:$0xff] }
 0x1e4   : > { %v225_v58 = vmul.f32 %v206_v57, %v202_v56  ;;  %v209_v59 = vmul.f32 %v206_v57, %v206_v57 }
 0x1e6   : > { %226 = vadd.xlane.f32.xlu1 %v225_v58  ;;  %210 = vadd.xlane.f32.xlu0 %v209_v59 }
 0x259   : > { %v211_v61 = vpop.xlane.xlu0 %210  ;;  %v227_v3 = vpop.xlane.xlu1 %226 }
 0x25a   : > { %v212_v62 = vsub.f32 %v208_v60, %v211_v61  ;;  %v228_v6 = vsub.f32 %v511_v14, %v227_v3 }
 0x25c   : > { %409 = vrsqrt.f32 %v212_v62  ;;  %vm219_vm3 = vweird.f32 %v212_v62 }
 0x262   : > { %v410_v63 = vpop.eup %409 }
 0x263   : > { %v214_v0 = vmul.f32 %v410_v63, %v212_v62  ;;  %vm220_vm0 = vweird.f32 %v410_v63 }
 0x264   : > { %vm221_vm4 = vmor %vm219_vm3, %vm220_vm0 }
 0x265   : > { %v215_v1 = vmul.f32 %v410_v63, %v214_v0 }
 0x267   : > { %v216_v2 = vmul.f32 0.5, %v215_v1 }
 0x269   : > { %v217_v4 = vsub.f32 1.5, %v216_v2 }
 0x26b   : > { %v218_v5 = vmul.f32 %v410_v63, %v217_v4 }
 0x26d   : > { %v222_v7 = vsel %vm221_vm4, %v410_v63, %v218_v5 }
 0x26e   : > { %v229_v8 = vmul.f32 %v228_v6, %v222_v7 }
 0x270   : > { %v232_v9 = vsel %vm231_vm5, %v229_v8, 0.0 }
 0x271   : > { %v233_v10 = vadd.f32 %v232_v9, %v202_v56 }
 0x273   : > { %234 = vst [vmem:[#allocation2] sm:$0xff] %v233_v10 }
 0x27a   : > { %v237_v11 = vld [vmem:[#allocation2] sm:$0xf] }
 0x27b   : > { %240 = vst [vmem:[%s109_s28] sm:$0xf] %v237_v11 }
 0x282   : > { %v267_v12 = vld [vmem:[%s109_s28] sm:$0xf] }
 0x283   : > { %268 = vst [vmem:[%s250_s3] sm:$0xf] %v267_v12 }
 0x284 PF: > { %s7_s10 = sadd.s32 1, %s449_s10   ;;  %s541_s6 = smov %s441_s8 }
 0x285   : > { %p4_p6 = scmp.ge.s32.totalorder %s7_s10, 8   ;;  %s542_s7 = smov %s445_s9 }
 0x286   : > { %s543_s8 = smov %s546_s12  ;;  %s544_s9 = smov %s550_s13 }
 0x287   :  { %6 = sbr.rel (!%p4_p6) target bundleno = 3 (0x3), region = 116 }

// kernel: custom-call.54
= control target key start
LH: loop header
LB: loop body
LE: loop exit
PB: predicated region body
PF: predicated region fallthrough
CT: control target
= control target key end

     0   :  { %s438_s6 = smov 0   ;;  %s440_s7 = smov 0   ;;  %s509_s0 = inlined_call_operand.vmem [shape: f32[2,3,1,4,4], index: 0, kind: input, shape index: {}]   ;;  %s510_s1 = inlined_call_operand.vmem [shape: f32[2,3,1,4,4], index: 1, kind: output, shape index: {}]  }
   0x1   :  { %s442_s8 = smov 0   ;;  %s444_s9 = smov 0  }
   0x2   :  { %s446_s10 = smov 0  }
   0x3 LB: > { %s330_s11 = sadd.s32 4294967295, %s425_s10   ;;  %s36_s12 = sadd.s32 1, %s417_s8  ;;  %s425_s10 = sphi %s446_s10, %s7_s10   ;;  %s421_s9 = sphi %s444_s9, %s514_s9   ;;  %s417_s8 = sphi %s442_s8, %s513_s8   ;;  %s413_s7 = sphi %s440_s7, %s512_s7   ;;  %s409_s6 = sphi %s438_s6, %s511_s6  }
   0x4   : > { %p38_p0 = scmp.ge.s32.totalorder %s36_s12, 3  ;;  %s40_s13 = sadd.s32 1, %s421_s9 }
   0x5   : > { %p332_p2 = scmp.ge.s32.totalorder %s425_s10, 6 }
   0x6   : > { %s516_s12 = smov (%p38_p0, %s36_s12), 0  ;;  %s518_s13 = smov (!%p38_p0, %s40_s13), %s421_s9 }
   0x7   : > { %p42_p1 = scmp.ge.s32.totalorder %s518_s13, 2  ;;  %54 = sbr.rel (%p332_p2) target bundleno = 15 (0xf), region = 16 }
   0x8   : > { %s56_s14 = sand.u32 (!%p332_p2), 1, %s425_s10   ;;  %s342_s15 = smul.u32 (!%p332_p2), 3, %s421_s9 }
   0x9   : > { %s520_s13 = smov (%p42_p1, %s518_s13), 0  ;;  %s333_s16 = sshll.u32 (!%p332_p2), %s56_s14, 2 }
   0xa   : > { %s63_s17 = sadd.s32 (!%p332_p2), %s417_s8, %s342_s15  ;;  %s58_s22 = scalar_lea.vmem (!%p332_p2), [#allocation1], %s333_s16 }
   0xb   : > { %s334_s18 = sshll.u32 (!%p332_p2), %s63_s17, 2 }
   0xc   : > { %s65_s21 = scalar_lea.vmem %s509_s0, %s334_s18 }
   0xd   : > { %v82_v0 = vld [vmem:[%s65_s21] sm:$0xf] }
   0xe   : > { %83 = vst [vmem:[%s58_s22] sm:$0xf] %v82_v0 }
   0xf PF: > { %p335_p3 = scmp.ge.s32.totalorder %s425_s10, 1  ;;  %p100_p4 = scmp.lt.s32.totalorder %s425_s10, 7 }
  0x11   : > { %p101_p5 = pnand %p335_p3, %p100_p4 }
  0x13   : > { %104 = sbr.rel (%p101_p5) target bundleno = 559 (0x22f), region = 50 }
  0x18   : > { %s480_s23 = sand.u32 1, %s330_s11   ;;  %v122_v1 = vlaneseq  ;;  %v427_v20 = vmov -1.0   ;;  %s343_s26 = smul.u32 3, %s413_s7 }
  0x19   : > { %s336_s24 = sshll.u32 %s480_s23, 2 }
  0x1a   : > { %s113_s25 = scalar_lea.vmem [#allocation1], %s336_s24  ;;  %v123_v3 = vand.u32 127, %v122_v1  ;;  %v126_v4 = vshrl.u32 %v122_v1, 7  ;;  %s225_s27 = sadd.s32 %s409_s6, %s343_s26 }
  0x1b   : > { %v120_v2 = vld [vmem:[%s113_s25] sm:$0xf]  ;;  %s117_s28 = scalar_lea.vmem [#allocation3], %s336_s24  ;;  %s339_s29 = sshll.u32 %s225_s27, 2 }
  0x1c   : > { %121 = vst [vmem:[#allocation0] sm:$0xf] %v120_v2  ;;  %vm128_vm0 = vcmp.eq.s32.totalorder %v126_v4, %v123_v3  ;;  %vm124_vm1 = vcmp.lt.s32.totalorder %v123_v3, 4  ;;  %vm133_vm2 = vcmp.ge.s32.totalorder %v126_v4, %v123_v3  ;;  %vm160_vm8 = vcmp.eq.s32.totalorder %v123_v3, 0  ;;  %s227_s3 = scalar_lea.vmem %s510_s1, %s339_s29 }
  0x1d   : > { %vm134_vm3 = vmand %vm133_vm2, %vm124_vm1  ;;  %vm157_vm9 = vcmp.eq.s32.totalorder %v123_v3, %v126_v4  ;;  %v161_v21 = vsel %vm160_vm8, 1.0, %v427_v20  ;;  %vm168_vm10 = vcmp.eq.s32.totalorder %v123_v3, 1  ;;  %vm178_vm11 = vcmp.eq.s32.totalorder %v123_v3, 2 }
  0x1e   : > { %v162_v22 = vsel %vm157_vm9, %v161_v21, 0.0  ;;  %vm188_vm12 = vcmp.eq.s32.totalorder %v123_v3, 3 }
  0x23   : > { %v129_v5 = vld [vmem:[#allocation0] sm:$0xff] }
  0x24   : > { %v130_v6 = vsel %vm128_vm0, %v129_v5, 0.0  ;;  %v135_v15 = vsel %vm134_vm3, %v129_v5, 0.0 }
  0x25   : > { %131 = vadd.xlane.f32.xlu0 %v130_v6 }
  0x98   : > { %v132_v7 = vpop.xlane.xlu0 %131 }
  0x99   : > { %385 = vrcp.f32 %v132_v7  ;;  %v147_v11 = vand.u32 2147483648, %v132_v7  ;;  %v145_v13 = vand.u32 2147483647, %v132_v7  ;;  %vm141_vm5 = vweird.f32 %v132_v7 }
  0x9b   : > { %v148_v16 = vor.u32 1.1754944e-38, %v147_v11  ;;  %vm146_vm7 = vcmp.eq.f32.partialorder %v145_v13, 8.507059e+37 }
  0x9f   : > { %v386_v8 = vpop.eup %385 }
  0xa0   : > { %v137_v9 = vmul.f32 %v386_v8, %v132_v7  ;;  %vm142_vm4 = vweird.f32 %v386_v8 }
  0xa1   : > { %vm143_vm6 = vmor %vm141_vm5, %vm142_vm4 }
  0xa2   : > { %v138_v10 = vsub.f32 1.0, %v137_v9 }
  0xa4   : > { %v139_v12 = vmul.f32 %v386_v8, %v138_v10 }
  0xa6   : > { %v140_v14 = vadd.f32 %v386_v8, %v139_v12 }
  0xa8   : > { %v144_v17 = vsel %vm143_vm6, %v386_v8, %v140_v14 }
  0xa9   : > { %v149_v18 = vsel %vm146_vm7, %v148_v16, %v144_v17 }
  0xaa   : > { %v150_v19 = vmul.f32 %v149_v18, %v135_v15 }
  0xac   : > { %151 = vst [vmem:[#allocation4] sm:$0xff] %v150_v19 }
  0xb3   : > { %v164_v23 = vld [vmem:[#allocation4 + $0x1] ss:$0 sm:$0xff]  ;;  %v174_v26 = vld [vmem:[#allocation4 + $0x2] ss:$0 sm:$0xff]  ;;  %v184_v31 = vld [vmem:[#allocation4 + $0x3] ss:$0 sm:$0xff] }
  0xb4   : > { %v165_v24 = vxor.u32 2147483648, %v164_v23  ;;  %v175_v28 = vxor.u32 2147483648, %v174_v26  ;;  %v185_v33 = vxor.u32 2147483648, %v184_v31 }
  0xb6   : > { %v169_v25 = vmul.f32 %v165_v24, %v162_v22 }
  0xb8   : > { %170 = vadd.xlane.f32.xlu0 %v169_v25 }
 0x12b   : > { %v171_v27 = vpop.xlane.xlu0 %170 }
 0x12c   : > { %v172_v29 = vsel %vm168_vm10, %v171_v27, %v162_v22 }
 0x12d   : > { %v179_v30 = vmul.f32 %v175_v28, %v172_v29 }
 0x12f   : > { %180 = vadd.xlane.f32.xlu1 %v179_v30 }
 0x1a2   : > { %v181_v32 = vpop.xlane.xlu1 %180 }
 0x1a3   : > { %v182_v34 = vsel %vm178_vm11, %v181_v32, %v172_v29 }
 0x1a4   : > { %v189_v35 = vmul.f32 %v185_v33, %v182_v34 }
 0x1a6   : > { %190 = vadd.xlane.f32.xlu1 %v189_v35 }
 0x219   : > { %v191_v36 = vpop.xlane.xlu1 %190 }
 0x21a   : > { %v192_v37 = vsel %vm188_vm12, %v191_v36, %v182_v34 }
 0x21b   : > { %v207_v38 = vmul.f32 %v192_v37, %v149_v18 }
 0x21d   : > { %v209_v39 = vsel %vm141_vm5, %v192_v37, %v207_v38 }
 0x21e   : > { %210 = vst [vmem:[#allocation2] sm:$0xff] %v209_v39 }
 0x225   : > { %v213_v40 = vld [vmem:[#allocation2] sm:$0xf] }
 0x226   : > { %216 = vst [vmem:[%s117_s28] sm:$0xf] %v213_v40 }
 0x22d   : > { %v244_v41 = vld [vmem:[%s117_s28] sm:$0xf] }
 0x22e   : > { %245 = vst [vmem:[%s227_s3] sm:$0xf] %v244_v41 }
 0x22f PF: > { %s7_s10 = sadd.s32 1, %s425_s10   ;;  %s511_s6 = smov %s417_s8 }
 0x230   : > { %p4_p6 = scmp.ge.s32.totalorder %s7_s10, 8   ;;  %s512_s7 = smov %s421_s9 }
 0x231   : > { %s513_s8 = smov %s516_s12  ;;  %s514_s9 = smov %s520_s13 }
 0x232   :  { %6 = sbr.rel (!%p4_p6) target bundleno = 3 (0x3), region = 113 }

// kernel: custom-call.22
= control target key start
LH: loop header
LB: loop body
LE: loop exit
PB: predicated region body
PF: predicated region fallthrough
CT: control target
= control target key end

     0   :  { %s2268_s0 = inlined_call_operand.vmem [shape: f32[2,3,2,2], index: 0, kind: input, shape index: {}]   ;;  %s2269_s1 = inlined_call_operand.vmem [shape: f32[2,3,2,2], index: 1, kind: input, shape index: {}]   ;;  %s2270_s2 = inlined_call_operand.vmem [shape: f32[2,3,2,2], index: 2, kind: input, shape index: {}]   ;;  %s2271_s3 = inlined_call_operand.vmem [shape: f32[2,3,2,2], index: 3, kind: input, shape index: {}]   ;;  %s2272_s4 = inlined_call_operand.vmem [shape: f32[2,3,2], index: 4, kind: output, shape index: {0}]   ;;  %s2273_s5 = inlined_call_operand.vmem [shape: f32[2,3,2], index: 5, kind: output, shape index: {1}]   ;;  %s2274_s6 = inlined_call_operand.vmem [shape: f32[2,3,2,2], index: 6, kind: output, shape index: {2}]   ;;  %s2275_s7 = inlined_call_operand.vmem [shape: f32[2,3,2,2], index: 7, kind: output, shape index: {3}]   ;;  %s2276_s8 = inlined_call_operand.vmem [shape: f32[2,3,2,2], index: 8, kind: output, shape index: {4}]   ;;  %s2277_s9 = inlined_call_operand.vmem [shape: f32[2,3,2,2], index: 9, kind: output, shape index: {5}]  }
   0x1   :  { %2283 = sst [smem:[#allocation38_spill]] %s2277_s9 }
   0x2   :  { %s1894_s30 = smov 0   ;;  %s1896_s10 = smov 0  }
   0x3   :  { %s1898_s11 = smov 0   ;;  %s1900_s12 = smov 0  }
   0x4   :  { %s1902_s13 = smov 0   ;;  %s1904_s14 = smov 0  }
   0x5   :  { %s1906_s15 = smov 0  }
   0x6 LB: > { %2284 = sst [smem:[#allocation33_spill]] %s1811_s10  ;;  %s25_s16 = sadd.s32 1, %s1823_s13  ;;  %s1831_s15 = sphi %s1906_s15, %s16_s15   ;;  %s1827_s14 = sphi %s1904_s14, %s2307_s14   ;;  %s1823_s13 = sphi %s1902_s13, %s2309_s13   ;;  %s1819_s12 = sphi %s1900_s12, %s2305_s12   ;;  %s1815_s11 = sphi %s1898_s11, %s2308_s11   ;;  %s1811_s10 = sphi %s1896_s10, %s2304_s10   ;;  %s1807_s30 = sphi %s1894_s30, %s2303_s30  }
   0x7   : > { %2285 = sst [smem:[#allocation34_spill]] %s1827_s14  ;;  %p26_p0 = scmp.ge.s32.totalorder %s25_s16, 3 }
   0x8   : > { %s28_s17 = sadd.s32 1, %s1827_s14  ;;  %s2278_s18 = sadd.s32 4294967295, %s1831_s15  }
   0x9   : > { %s32_s19 = sshrl.u32 %s1823_s13, 3  ;;  %s2311_s16 = smov (%p26_p0, %s25_s16), 0 }
   0xa   : > { %2286 = sst [smem:[#allocation35_spill]] %s2311_s16  ;;  %s2313_s17 = smov (!%p26_p0, %s28_s17), %s1827_s14 }
   0xb   : > { %s33_s20 = sshrl.u32 %s2311_s16, 3  ;;  %p49_p1 = scmp.ne.s32.totalorder %s1811_s10, %s1807_s30 }
   0xc   : > { %p30_p2 = scmp.ge.s32.totalorder %s2313_s17, 2  ;;  %s35_s21 = ssub.s32 %s32_s19, %s33_s20 }
   0xd   : > { %p50_p3 = scmp.eq.s32.totalorder %s2278_s18, 5  ;;  %s39_s25 = sadd.s32 1, %s1811_s10 }
   0xe   : > { %s2315_s17 = smov (%p30_p2, %s2313_s17), 0  ;;  %p1626_p6 = scmp.ge.s32.totalorder %s1831_s15, 6 }
   0xf   : > { %2287 = sst [smem:[#allocation36_spill]] %s2315_s17  ;;  %p1943_p4 = por %p50_p3, %p49_p1 }
  0x10   : > { %s34_s23 = ssub.s32 %s1827_s14, %s2315_s17  ;;  %s104_s27 = sand.u32 (!%p1626_p6), 1, %s1831_s15  }
  0x11   : > { %s36_s24 = sor.u32 %s35_s21, %s34_s23  ;;  %s1676_s28 = smul.u32 (!%p1626_p6), 3, %s1827_s14 }
  0x12   : > { %p37_p5 = scmp.eq.s32.totalorder %s36_s24, 0  ;;  %102 = sbr.rel (%p1626_p6) target bundleno = 28 (0x1c), region = 16 }
  0x13   : > { %s1627_s29 = sshll.u32 (!%p1626_p6), %s104_s27, 1  ;;  %s108_s19 = sadd.s32 (!%p1626_p6), %s1823_s13, %s1676_s28 }
  0x14   : > { %s1951_s26 = scalar_select %p37_p5, %s1811_s10, %s39_s25  }
  0x15   : > { %s1628_s20 = sshll.u32 (!%p1626_p6), %s108_s19, 1  ;;  %s106_s9 = scalar_lea.vmem (!%p1626_p6), [#allocation1], %s1627_s29 }
  0x16   : > { %2289 = sst [smem:[#allocation37_spill]] %s1951_s26  ;;  %s110_s17 = scalar_lea.vmem (!%p1626_p6), %s2268_s0, %s1628_s20 }
  0x17   : > { %s151_s24 = scalar_lea.vmem %s2269_s1, %s1628_s20  ;;  %v127_v0 = vld [vmem:[%s110_s17] sm:$0x3]  ;;  %s192_s10 = scalar_lea.vmem %s2270_s2, %s1628_s20 }
  0x18   : > { %v168_v1 = vld [vmem:[%s151_s24] sm:$0x3]  ;;  %128 = vst [vmem:[%s106_s9] sm:$0x3] %v127_v0  ;;  %s233_s19 = scalar_lea.vmem %s2271_s3, %s1628_s20  ;;  %s147_s14 = scalar_lea.vmem [#allocation3], %s1627_s29 }
  0x19   : > { %v209_v2 = vld [vmem:[%s192_s10] sm:$0x3]  ;;  %169 = vst [vmem:[%s147_s14] sm:$0x3] %v168_v1  ;;  %s188_s16 = scalar_lea.vmem [#allocation5], %s1627_s29  ;;  %s229_s18 = scalar_lea.vmem [#allocation7], %s1627_s29 }
  0x1a   : > { %v250_v3 = vld [vmem:[%s233_s19] sm:$0x3]  ;;  %210 = vst [vmem:[%s188_s16] sm:$0x3] %v209_v2 }
  0x1b   : > { %251 = vst [vmem:[%s229_s18] sm:$0x3] %v250_v3 }
  0x1c PF: > { %p1635_p7 = scmp.ge.s32.totalorder %s1831_s15, 1  ;;  %p268_p8 = scmp.lt.s32.totalorder %s1831_s15, 7 }
  0x1e   : > { %p269_p9 = pnand %p1635_p7, %p268_p8 }
  0x20   : > { %272 = sbr.rel (%p269_p9) target bundleno = 966 (0x3c6), region = 140 }
  0x25   : > { %s2290_s9 = sadd.s32 4294967295, %s1831_s15   ;;  %s309_s17 = sand.u32 1, %s1807_s30   ;;  %v369_v4 = vlaneseq  ;;  %v1841_v5 = vmov 0.0  }
  0x26   : > { %s291_s10 = sand.u32 1, %s2290_s9   ;;  %s1976_s14 = sshll.u32 %s309_s17, 2  ;;  %364 = vst [vmem:[#allocation12] sm:$0xff] %v1841_v5 }
  0x27   : > { %s1974_s26 = sshll.u32 %s291_s10, 1  ;;  %365 = vst [vmem:[#allocation14] sm:$0xff] %v1841_v5  ;;  %v1978_v6 = vand.u32 127, %v369_v4  ;;  %v1980_v7 = vshrl.u32 %v369_v4, 7  ;;  %s352_s23 = smov [#allocation20] }
  0x28   : > { %s293_s29 = scalar_lea.vmem [#allocation1], %s1974_s26  ;;  %s297_s20 = scalar_lea.vmem [#allocation3], %s1974_s26  ;;  %366 = vst [vmem:[#allocation16] sm:$0xff] %v1841_v5 }
  0x29   : > { %v336_v8 = vld [vmem:[%s293_s29] sm:$0x3]  ;;  %v340_v9 = vld [vmem:[%s297_s20] sm:$0x3]  ;;  %s301_s30 = scalar_lea.vmem [#allocation5], %s1974_s26  ;;  %s305_s21 = scalar_lea.vmem [#allocation7], %s1974_s26  ;;  %v371_v6 = vmov %v1978_v6  ;;  %v374_v7 = vmov %v1980_v7 }
  0x2a   : > { %337 = vst [vmem:[#allocation0] sm:$0x3] %v336_v8  ;;  %v344_v10 = vld [vmem:[%s301_s30] sm:$0x3]  ;;  %v348_v11 = vld [vmem:[%s305_s21] sm:$0x3]  ;;  %vm378_vm0 = vcmp.eq.s32.totalorder %v374_v7, %v371_v6  ;;  %v384_v6 = vmov %v1978_v6  ;;  %v387_v7 = vmov %v1980_v7 }
  0x2b   : > { %341 = vst [vmem:[#allocation2] sm:$0x3] %v340_v9  ;;  %s368_s24 = smov [#allocation12]  ;;  %s355_s25 = smov [#allocation21]  ;;  %vm391_vm1 = vcmp.eq.s32.totalorder %v387_v7, %v384_v6  ;;  %vm1503_vm2 = vcmp.lt.s32.totalorder %v1978_v6, 2  ;;  %v1495_v6 = vmov %v1978_v6  ;;  %v1498_v7 = vmov %v1980_v7 }
  0x2c   : > { %345 = vst [vmem:[#allocation4] sm:$0x3] %v344_v10  ;;  %s358_s27 = smov [#allocation22]  ;;  %s361_s28 = smov [#allocation23]  ;;  %v1512_v6 = vmov %v1978_v6  ;;  %v1515_v7 = vmov %v1980_v7  ;;  %vm1508_vm3 = vcmp.eq.s32.totalorder %v1498_v7, %v1495_v6 }
  0x2d   : > { %349 = vst [vmem:[#allocation6] sm:$0x3] %v348_v11  ;;  %v375_v12 = vld [vmem:[%s368_s24] sm:$0x3]  ;;  %s381_s19 = smov [#allocation18]  ;;  %s321_s9 = scalar_lea.vmem [#allocation13], %s1974_s26  ;;  %v1529_v6 = vmov %v1978_v6  ;;  %v1532_v7 = vmov %v1980_v7 }
  0x2e   : > { %367 = vst [vmem:[#allocation18] sm:$0xff] %v1841_v5  ;;  %v379_v16 = vsel %vm378_vm0, 1.0, %v375_v12  ;;  %s1499_s20 = smov [#allocation20]  ;;  %s1516_s30 = smov [#allocation21]  ;;  %v1546_v6 = vmov %v1978_v6  ;;  %v1549_v7 = vmov %v1980_v7 }
  0x2f   : > { %380 = vst [vmem:[%s368_s24] sm:$0x3] %v379_v16  ;;  %s1533_s21 = smov [#allocation22]  ;;  %vm1559_vm4 = vcmp.eq.s32.totalorder %v1549_v7, %v1546_v6 }
  0x31   : > { %v353_v13 = vld [vmem:[#allocation0] sm:$0xff] }
  0x32   : > { %354 = vst [vmem:[%s352_s23] sm:$0xff] %v353_v13  ;;  %v356_v14 = vld [vmem:[#allocation2] sm:$0xff]  ;;  %s1550_s23 = smov [#allocation23] }
  0x33   : > { %357 = vst [vmem:[%s355_s25] sm:$0xff] %v356_v14  ;;  %v359_v15 = vld [vmem:[#allocation4] sm:$0xff] }
  0x34   : > { %360 = vst [vmem:[%s358_s27] sm:$0xff] %v359_v15  ;;  %v362_v17 = vld [vmem:[#allocation6] sm:$0xff] }
  0x35   : > { %363 = vst [vmem:[%s361_s28] sm:$0xff] %v362_v17  ;;  %v388_v18 = vld [vmem:[%s381_s19] sm:$0x3] }
  0x36   : > { %v392_v19 = vsel %vm391_vm1, 1.0, %v388_v18 }
  0x37   : > { %393 = vst [vmem:[%s381_s19] sm:$0x3] %v392_v19 }
  0x39   : > { %v1505_v20 = vld [vmem:[%s1499_s20] sm:$0x3] }
  0x3a   : > { %v1522_v21 = vld [vmem:[%s1516_s30] sm:$0x3]  ;;  %v1506_v22 = vsel %vm1503_vm2, %v1505_v20, 0.0 }
  0x3b   : > { %v1523_v23 = vsel %vm1503_vm2, %v1522_v21, 0.0  ;;  %v1539_v24 = vld [vmem:[%s1533_s21] sm:$0x3]  ;;  %v1507_v26 = vmul.f32 %v1506_v22, %v1506_v22 }
  0x3c   : > { %v1556_v25 = vld [vmem:[%s1550_s23] sm:$0x3]  ;;  %v1524_v27 = vmul.f32 %v1523_v23, %v1523_v23  ;;  %v1540_v28 = vsel %vm1503_vm2, %v1539_v24, 0.0 }
  0x3d   : > { %v1557_v29 = vsel %vm1503_vm2, %v1556_v25, 0.0  ;;  %v1541_v30 = vmul.f32 %v1540_v28, %v1540_v28  ;;  %v1509_v33 = vsel %vm1508_vm3, 0.0, %v1507_v26 }
  0x3e   : > { %v1526_v31 = vadd.f32 %v1524_v27, %v1507_v26  ;;  %v1558_v32 = vmul.f32 %v1557_v29, %v1557_v29  ;;  %v1525_v35 = vadd.f32 %v1524_v27, %v1509_v33 }
  0x40   : > { %v1543_v34 = vadd.f32 %v1541_v30, %v1526_v31  ;;  %v1542_v37 = vadd.f32 %v1541_v30, %v1525_v35  ;;  %v1560_v38 = vsel %vm1559_vm4, 0.0, %v1558_v32 }
  0x42   : > { %v1562_v36 = vadd.f32 %v1558_v32, %v1543_v34  ;;  %v1561_v39 = vadd.f32 %v1560_v38, %v1542_v37 }
  0x44   : > { %1563 = vadd.xlane.f32.xlu0 %v1562_v36 }
  0x4c   : > { %1571 = vadd.xlane.f32.xlu0 %v1561_v39 }
  0xb7   : > { %v1564_v40 = vpop.xlane.xlu0 %1563 }
  0xb8   : > { %v1565_v41 = vrot.slane %v1564_v40, 4 }
  0xba   : > { %v1566_v42 = vadd.f32 %v1565_v41, %v1564_v40 }
  0xbc   : > { %v1567_v43 = vrot.slane %v1566_v42, 2 }
  0xbe   : > { %v1568_v47 = vadd.f32 %v1567_v43, %v1566_v42 }
  0xbf   : > { %v1572_v44 = vpop.xlane.xlu0 %1571 }
  0xc0   : > { %v1573_v45 = vrot.slane %v1572_v44, 4  ;;  %v1569_v50 = vrot.slane %v1568_v47, 1 }
  0xc2   : > { %v1574_v46 = vadd.f32 %v1573_v45, %v1572_v44  ;;  %v1570_v53 = vadd.f32 %v1569_v50, %v1568_v47 }
  0xc4   : > { %v1575_v48 = vrot.slane %v1574_v46, 2 }
  0xc6   : > { %v1576_v49 = vadd.f32 %v1575_v48, %v1574_v46 }
  0xc8   : > { %v1577_v51 = vrot.slane %v1576_v49, 1 }
  0xca   : > { %v1578_v52 = vadd.f32 %v1577_v51, %v1576_v49 }
  0xcc   : > { %1677 = vpush %v1578_v52 }
  0xcd   : > { %1679 = vpush %v1570_v53 }
  0xfd   : > { %s1678_s24 = spop %1677 }
  0xfe   : > { %s1680_s25 = spop %1679 }
  0xff   : > { %s1581_s27 = smul.f32 1e-10, %s1680_s25 }
 0x101   : > { %p1582_p10 = scmp.le.f32.partialorder %s1678_s24, %s1581_s27 }
 0x102   : > { %s2013_s28 = smov (!%p1582_p10), 0  }
 0x103   : > { %1585 = sbr.rel (%p1582_p10) target bundleno = 917 (0x395), region = 467 }
 0x108 LB: >> { %s2018_s19 = smov 0   ;;  %s1835_s28 = sphi %s2013_s28, %s2291_s28  }
 0x109 LB: >>> { %s498_s20 = smov [#allocation20]  ;;  %v502_v6 = vmov %v1978_v6  ;;  %v505_v7 = vmov %v1980_v7  ;;  %s518_s30 = smov [#allocation21]  ;;  %s1839_s19 = sphi %s2018_s19, %s497_s19  }
 0x10a   : >>> { %v522_v6 = vmov %v1978_v6  ;;  %v525_v7 = vmov %v1980_v7  ;;  %v506_v54 = vld [vmem:[%s498_s20] sm:$0x3]  ;;  %vm509_vm5 = vcmp.eq.s32.totalorder %v505_v7, %v502_v6  ;;  %s538_s21 = smov [#allocation23]  ;;  %s499_s23 = smov [#allocation24] }
 0x10b   : >>> { %vm529_vm6 = vcmp.eq.s32.totalorder %v525_v7, %v522_v6  ;;  %v542_v6 = vmov %v1978_v6  ;;  %v545_v7 = vmov %v1980_v7  ;;  %v510_v55 = vsel %vm509_vm5, %v506_v54, 0.0  ;;  %v526_v56 = vld [vmem:[%s518_s30] sm:$0x3]  ;;  %s519_s24 = smov [#allocation25]  ;;  %s539_s25 = smov [#allocation26] }
 0x10c   : >>> { %vm549_vm7 = vcmp.eq.s32.totalorder %v545_v7, %v542_v6  ;;  %v511_v57 = vrot.slane %v510_v55, 4  ;;  %v530_v58 = vsel %vm529_vm6, %v526_v56, 0.0  ;;  %v546_v59 = vld [vmem:[%s538_s21] sm:$0x3]  ;;  %s562_s27 = smov [#allocation25]  ;;  %s560_s20 = smov [#allocation24]  ;;  %v651_v6 = vmov %v1978_v6 }
 0x10d   : >>> { %v531_v60 = vrot.slane %v530_v58, 4  ;;  %v550_v61 = vsel %vm549_vm7, %v546_v59, 0.0  ;;  %s564_s30 = smov [#allocation26]  ;;  %s639_s21 = smov [#allocation27]  ;;  %v654_v7 = vmov %v1980_v7 }
 0x10e   : >>> { %v512_v62 = vadd.f32 %v511_v57, %v510_v55  ;;  %v551_v63 = vrot.slane %v550_v61, 4  ;;  %s2044_s18 = smov [#allocation12]  ;;  %s2046_s16 = smov [#allocation14] }
 0x10f   : >>> { %v532_v0 = vadd.f32 %v531_v60, %v530_v58  ;;  %s2051_s29 = smov [#allocation16]  ;;  %s903_s17 = smov [#allocation32] }
 0x110   : >>> { %v513_v1 = vrot.slane %v512_v62, 2  ;;  %v552_v2 = vadd.f32 %v551_v63, %v550_v61  ;;  %s2054_s10 = smov [#allocation18]  ;;  %s497_s19 = sadd.s32 1, %s1839_s19  }
 0x111   : >>> { %v533_v3 = vrot.slane %v532_v0, 2  ;;  %p494_p11 = scmp.ge.s32.totalorder %s497_s19, 3  }
 0x112   : >>> { %v514_v4 = vadd.f32 %v513_v1, %v512_v62  ;;  %v553_v5 = vrot.slane %v552_v2, 2 }
 0x113   : >>> { %v534_v8 = vadd.f32 %v533_v3, %v532_v0 }
 0x114   : >>> { %v515_v9 = vrot.slane %v514_v4, 1  ;;  %v554_v10 = vadd.f32 %v553_v5, %v552_v2 }
 0x115   : >>> { %v535_v11 = vrot.slane %v534_v8, 1 }
 0x116   : >>> { %v516_v12 = vadd.f32 %v515_v9, %v514_v4  ;;  %v555_v13 = vrot.slane %v554_v10, 1 }
 0x117   : >>> { %v536_v14 = vadd.f32 %v535_v11, %v534_v8 }
 0x118   : >>> { %517 = vst [vmem:[%s499_s23] sm:$0x1] %v516_v12  ;;  %v556_v15 = vadd.f32 %v555_v13, %v554_v10  ;;  %s641_s23 = smov [#allocation28] }
 0x119   : >>> { %537 = vst [vmem:[%s519_s24] sm:$0x1] %v536_v14  ;;  %s558_s24 = smov [#allocation29] }
 0x11a   : >>> { %557 = vst [vmem:[%s539_s25] sm:$0x1] %v556_v15  ;;  %s559_s25 = smov [#allocation30]  ;;  %s643_s24 = smov %s558_s24 }
 0x11b   : >>> { %s645_s25 = smov %s559_s25 }
 0x11f   : >>> { %v561_v23 = vld [vmem:[%s560_s20] sm:$0xff]  ;;  %s662_s20 = smov [#allocation30] }
 0x120   : >>> { %v2029_v16 = vld [vmem:[%s562_s27] sm:$0xff]  ;;  %v615_v47 = vand.u32 2147483647, %v561_v23  ;;  %s647_s27 = smov [#allocation29] }
 0x121   : >>> { %v567_v17 = vmul.f32 2.0, %v2029_v16  ;;  %v565_v24 = vld [vmem:[%s564_s30] sm:$0xff]  ;;  %v616_v55 = vand.u32 2147483647, %v2029_v16  ;;  %s660_s30 = smov [#allocation31] }
 0x122   : >>> { %v566_v27 = vsub.f32 %v565_v24, %v561_v23  ;;  %v617_v48 = vand.u32 2147483647, %v565_v24 }
 0x123   : >>> { %1761 = vrcp.f32 %v567_v17  ;;  %v579_v20 = vand.u32 2147483648, %v567_v17  ;;  %vm573_vm8 = vweird.f32 %v567_v17  ;;  %v577_v22 = vand.u32 2147483647, %v567_v17 }
 0x124   : >>> { %v618_v50 = vmin.f32 %v615_v47, %v617_v48 }
 0x125   : >>> { %v580_v26 = vor.u32 1.1754944e-38, %v579_v20  ;;  %vm578_vm11 = vcmp.eq.f32.partialorder %v577_v22, 8.507059e+37 }
 0x126   : >>> { %v619_v56 = vmul.f32 1.1920929e-08, %v618_v50 }
 0x128   : >>> { %vm620_vm4 = vcmp.le.f32.partialorder %v616_v55, %v619_v56 }
 0x129   : >>> { %v1762_v18 = vpop.eup %1761 }
 0x12a   : >>> { %v569_v19 = vmul.f32 %v1762_v18, %v567_v17  ;;  %vm574_vm9 = vweird.f32 %v1762_v18 }
 0x12b   : >>> { %vm575_vm10 = vmor %vm573_vm8, %vm574_vm9  ;;  %vm656_vm8 = vcmp.eq.s32.totalorder %v654_v7, %v651_v6  ;;  %v666_v6 = vmov %v1978_v6  ;;  %v669_v7 = vmov %v1980_v7 }
 0x12c   : >>> { %v570_v21 = vsub.f32 1.0, %v569_v19  ;;  %vm671_vm9 = vcmp.eq.s32.totalorder %v669_v7, %v666_v6  ;;  %v737_v6 = vmov %v1978_v6 }
 0x12d   : >>> { %v778_v6 = vmov %v1978_v6 }
 0x12e   : >>> { %v571_v25 = vmul.f32 %v1762_v18, %v570_v21  ;;  %v764_v6 = vmov %v1978_v6 }
 0x130   : >>> { %v572_v28 = vadd.f32 %v1762_v18, %v571_v25 }
 0x132   : >>> { %v576_v29 = vsel %vm575_vm10, %v1762_v18, %v572_v28  ;;  %v911_v28 = vld [vmem:[%s2051_s29] sm:$0x3]  ;;  %vm861_vm10 = vcmp.eq.s32.totalorder %v1980_v7, 0 }
 0x133   : >>> { %v581_v30 = vsel %vm578_vm11, %v580_v26, %v576_v29  ;;  %vm873_vm11 = vcmp.eq.s32.totalorder %v1980_v7, 1  ;;  %v740_v7 = vmov %v1980_v7 }
 0x134   : >>> { %v582_v31 = vmul.f32 %v581_v30, %v566_v27  ;;  %v781_v7 = vmov %v1980_v7 }
 0x135   : >>> { %v767_v7 = vmov %v1980_v7 }
 0x136   : >>> { %v584_v32 = vmul.f32 %v582_v31, %v582_v31  ;;  %vm583_vm14 = vcmp.ge.f32.partialorder %v582_v31, 0.0 }
 0x138   : >>> { %v585_v33 = vadd.f32 1.0, %v584_v32 }
 0x13a   : >>> { %1763 = vrsqrt.f32 %v585_v33  ;;  %vm593_vm12 = vcmp.eq.f32.partialorder %v585_v33, inf  ;;  %v596_v40 = vand.u32 2147483648, %v585_v33  ;;  %vm595_vm13 = vcmp.eq.f32.partialorder %v585_v33, 0.0 }
 0x140   : >>> { %v1764_v34 = vpop.eup %1763 }
 0x141   : >>> { %v587_v35 = vmul.f32 %v1764_v34, %v585_v33 }
 0x143   : >>> { %v588_v36 = vmul.f32 %v1764_v34, %v587_v35 }
 0x145   : >>> { %v589_v37 = vmul.f32 0.5, %v588_v36 }
 0x147   : >>> { %v590_v38 = vsub.f32 1.5, %v589_v37 }
 0x149   : >>> { %v591_v39 = vmul.f32 %v1764_v34, %v590_v38 }
 0x14b   : >>> { %v592_v41 = vmul.f32 %v591_v39, %v585_v33 }
 0x14d   : >>> { %v594_v42 = vsel %vm593_vm12, %v585_v33, %v592_v41  ;;  %v912_v33 = vld [vmem:[%s2054_s10] sm:$0x3]  ;;  %vm745_vm12 = vcmp.eq.s32.totalorder %v740_v7, %v737_v6  ;;  %v751_v6 = vmov %v1978_v6  ;;  %v754_v7 = vmov %v1980_v7 }
 0x14e   : >>> { %v597_v43 = vsel %vm595_vm13, %v596_v40, %v594_v42  ;;  %vm786_vm13 = vcmp.eq.s32.totalorder %v781_v7, %v778_v6 }
 0x14f   : >>> { %v598_v44 = vxor.u32 2147483648, %v597_v43 }
 0x151   : >>> { %v599_v45 = vsel %vm583_vm14, %v597_v43, %v598_v44  ;;  %vm771_vm14 = vcmp.eq.s32.totalorder %v767_v7, %v764_v6 }
 0x152   : >>> { %v600_v46 = vadd.f32 %v599_v45, %v582_v31 }
 0x154   : >>> { %1765 = vrcp.f32 %v600_v46  ;;  %v612_v52 = vand.u32 2147483648, %v600_v46  ;;  %vm606_vm15 = vweird.f32 %v600_v46  ;;  %v610_v54 = vand.u32 2147483647, %v600_v46 }
 0x156   : >>> { %v613_v58 = vor.u32 1.1754944e-38, %v612_v52  ;;  %vm611_vm3 = vcmp.eq.f32.partialorder %v610_v54, 8.507059e+37 }
 0x15a   : >>> { %v1766_v49 = vpop.eup %1765 }
 0x15b   : >>> { %v602_v51 = vmul.f32 %v1766_v49, %v600_v46  ;;  %vm607_vm0 = vweird.f32 %v1766_v49 }
 0x15c   : >>> { %vm608_vm1 = vmor %vm606_vm15, %vm607_vm0  ;;  %vm758_vm15 = vcmp.eq.s32.totalorder %v754_v7, %v751_v6  ;;  %vm804_vm0 = vcmp.eq.s32.totalorder %v1978_v6, 1  ;;  %v401_v7 = vmov (%p494_p11), %v1980_v7 }
 0x15d   : >>> { %v603_v53 = vsub.f32 1.0, %v602_v51 }
 0x15f   : >>> { %v604_v57 = vmul.f32 %v1766_v49, %v603_v53 }
 0x161   : >>> { %v605_v59 = vadd.f32 %v1766_v49, %v604_v57 }
 0x163   : >>> { %v609_v60 = vsel %vm608_vm1, %v1766_v49, %v605_v59  ;;  %vm800_vm1 = vcmp.eq.s32.totalorder %v1978_v6, 0  ;;  %v398_v6 = vmov (%p494_p11), %v1978_v6 }
 0x164   : >>> { %v614_v61 = vsel %vm611_vm3, %v613_v58, %v609_v60  ;;  %vm413_vm3 = vcmp.eq.s32.totalorder (%p494_p11), %v401_v7, %v398_v6  ;;  %v417_v6 = vmov (%p494_p11), %v1978_v6  ;;  %v420_v7 = vmov (%p494_p11), %v1980_v7 }
 0x165   : >>> { %v621_v62 = vsel %vm620_vm4, 0.0, %v614_v61  ;;  %v434_v6 = vmov (%p494_p11), %v1978_v6  ;;  %v437_v7 = vmov (%p494_p11), %v1980_v7 }
 0x166   : >>> { %v622_v63 = vmul.f32 %v621_v62, %v621_v62  ;;  %v635_v0 = vmul.f32 %v621_v62, %v2029_v16  ;;  %v451_v6 = vmov (%p494_p11), %v1978_v6  ;;  %v454_v7 = vmov (%p494_p11), %v1980_v7 }
 0x167   : >> { %vm466_vm4 = vcmp.eq.s32.totalorder (%p494_p11), %v454_v7, %v451_v6 }
 0x168   : >>> { %v623_v1 = vadd.f32 1.0, %v622_v63  ;;  %v636_v2 = vsub.f32 %v561_v23, %v635_v0  ;;  %v638_v3 = vadd.f32 %v635_v0, %v565_v24  ;;  %v909_v23 = vld [vmem:[%s2044_s18] sm:$0x3] }
 0x169   : >>> { %v910_v24 = vld [vmem:[%s2046_s16] sm:$0x3] }
 0x16a   : >>> { %1767 = vrsqrt.f32 %v623_v1  ;;  %640 = vst [vmem:[%s639_s21] sm:$0xff] %v636_v2  ;;  %vm630_vm5 = vweird.f32 %v623_v1  ;;  %s675_s21 = smov [#allocation32] }
 0x16b   : >>> { %642 = vst [vmem:[%s641_s23] sm:$0xff] %v638_v3  ;;  %s677_s23 = smov [#allocation31] }
 0x170   : >>> { %v1768_v4 = vpop.eup %1767 }
 0x171   : >>> { %v625_v5 = vmul.f32 %v1768_v4, %v623_v1  ;;  %vm631_vm6 = vweird.f32 %v1768_v4 }
 0x172   : >>> { %vm632_vm7 = vmor %vm630_vm5, %vm631_vm6 }
 0x173   : >>> { %v626_v8 = vmul.f32 %v1768_v4, %v625_v5 }
 0x175   : >>> { %v627_v9 = vmul.f32 0.5, %v626_v8 }
 0x177   : >>> { %v628_v10 = vsub.f32 1.5, %v627_v9 }
 0x179   : >>> { %v629_v11 = vmul.f32 %v1768_v4, %v628_v10 }
 0x17b   : >>> { %v633_v12 = vsel %vm632_vm7, %v1768_v4, %v629_v11 }
 0x17c   : >>> { %644 = vst [vmem:[%s643_s24] sm:$0xff] %v633_v12  ;;  %v634_v13 = vmul.f32 %v633_v12, %v621_v62  ;;  %s2038_s24 = smov [#allocation20] }
 0x17d   : >>> { %v685_v26 = vld [vmem:[%s2038_s24] sm:$0x3] }
 0x17e   : >>> { %646 = vst [vmem:[%s645_s25] sm:$0xff] %v634_v13  ;;  %s2040_s25 = smov [#allocation21] }
 0x17f   : >>> { %v686_v20 = vld [vmem:[%s2040_s25] sm:$0x3] }
 0x183   : >>> { %v648_v14 = vld [vmem:[%s647_s27] ss:$0 sm:$0xff]  ;;  %s2042_s27 = smov [#allocation22] }
 0x184   : >>> { %v657_v15 = vsel %vm656_vm8, %v648_v14, 0.0  ;;  %v687_v21 = vld [vmem:[%s2042_s27] sm:$0x3] }
 0x185   : >>> { %658 = vadd.xlane.f32.xlu0 %v657_v15  ;;  %v663_v16 = vld [vmem:[%s662_s20] ss:$0 sm:$0xff]  ;;  %s901_s20 = smov [#allocation31] }
 0x186   : >>> { %v672_v17 = vsel %vm671_vm9, %v663_v16, 0.0 }
 0x18d   : >>> { %673 = vadd.xlane.f32.xlu0 %v672_v17 }
 0x1f8   : >>> { %v659_v18 = vpop.xlane.xlu0 %658 }
 0x1f9   : >>> { %661 = vst [vmem:[%s660_s30] sm:$0xff] %v659_v18  ;;  %s2048_s30 = smov [#allocation23] }
 0x1fa   : >>> { %v688_v27 = vld [vmem:[%s2048_s30] sm:$0x3] }
 0x200   : >>> { %v674_v19 = vpop.xlane.xlu0 %673  ;;  %v678_v22 = vld [vmem:[%s677_s23] sm:$0xff]  ;;  %s705_s23 = smov [#allocation29] }
 0x201   : >>> { %676 = vst [vmem:[%s675_s21] sm:$0xff] %v674_v19  ;;  %s679_s21 = smov [#allocation32]  ;;  %v902_v25 = vld [vmem:[%s901_s20] sm:$0xff]  ;;  %v692_v29 = vmul.f32 %v686_v20, %v678_v22  ;;  %v696_v30 = vmul.f32 %v687_v21, %v678_v22  ;;  %v689_v50 = vmul.f32 %v685_v26, %v678_v22  ;;  %v699_v52 = vmul.f32 %v688_v27, %v678_v22  ;;  %s707_s20 = smov [#allocation30] }
 0x202   : >>> { %v913_v34 = vmul.f32 %v909_v23, %v902_v25  ;;  %v916_v35 = vmul.f32 %v910_v24, %v902_v25  ;;  %v920_v42 = vmul.f32 %v911_v28, %v902_v25  ;;  %v923_v46 = vmul.f32 %v912_v33, %v902_v25  ;;  %v706_v56 = vld [vmem:[%s705_s23] ss:$0 sm:$0xff]  ;;  %s774_s23 = smov [#allocation23] }
 0x203   : >>> { %v708_v57 = vld [vmem:[%s707_s20] ss:$0 sm:$0xff]  ;;  %s761_s20 = smov [#allocation22] }
 0x208   : >>> { %v680_v31 = vld [vmem:[%s679_s21] sm:$0xff]  ;;  %s2070_s21 = smov [#allocation22] }
 0x209   : >>> { %v904_v32 = vld [vmem:[%s903_s17] sm:$0xff]  ;;  %v693_v36 = vmul.f32 %v688_v27, %v680_v31  ;;  %v695_v37 = vmul.f32 %v685_v26, %v680_v31  ;;  %v690_v43 = vmul.f32 %v687_v21, %v680_v31  ;;  %v698_v47 = vmul.f32 %v686_v20, %v680_v31  ;;  %s2065_s17 = smov [#allocation12] }
 0x20a   : >>> { %v914_v38 = vmul.f32 %v911_v28, %v904_v32  ;;  %v917_v39 = vmul.f32 %v912_v33, %v904_v32  ;;  %v919_v40 = vmul.f32 %v909_v23, %v904_v32  ;;  %v922_v41 = vmul.f32 %v910_v24, %v904_v32 }
 0x20b   : >>> { %v694_v44 = vsub.f32 %v692_v29, %v693_v36  ;;  %v697_v45 = vadd.f32 %v696_v30, %v695_v37  ;;  %v691_v54 = vsub.f32 %v689_v50, %v690_v43  ;;  %v700_v55 = vadd.f32 %v699_v52, %v698_v47 }
 0x20c   : >>> { %v915_v48 = vsub.f32 %v913_v34, %v914_v38  ;;  %v918_v49 = vsub.f32 %v916_v35, %v917_v39  ;;  %v921_v51 = vadd.f32 %v920_v42, %v919_v40  ;;  %v924_v53 = vadd.f32 %v923_v46, %v922_v41 }
 0x20d   : >>> { %702 = vst [vmem:[%s2040_s25] sm:$0x3] %v694_v44  ;;  %s2072_s25 = smov [#allocation21] }
 0x20e   : >>> { %703 = vst [vmem:[%s2042_s27] sm:$0x3] %v697_v45  ;;  %s930_s27 = smov [#allocation16] }
 0x20f   : >>> { %925 = vst [vmem:[%s2044_s18] sm:$0x3] %v915_v48  ;;  %s2074_s18 = smov [#allocation14] }
 0x210   : >>> { %926 = vst [vmem:[%s2046_s16] sm:$0x3] %v918_v49  ;;  %s2079_s16 = smov [#allocation18] }
 0x211   : >>> { %927 = vst [vmem:[%s2051_s29] sm:$0x3] %v921_v51  ;;  %s712_s29 = smov [#allocation23] }
 0x212   : >>> { %928 = vst [vmem:[%s2054_s10] sm:$0x3] %v924_v53  ;;  %s2082_s10 = smov [#allocation20] }
 0x213   : >>> { %701 = vst [vmem:[%s2038_s24] sm:$0x3] %v691_v54  ;;  %s734_s24 = smov [#allocation27] }
 0x214   : >>> { %704 = vst [vmem:[%s2048_s30] sm:$0x3] %v700_v55  ;;  %v714_v59 = vld [vmem:[%s2072_s25] sm:$0x3]  ;;  %s775_s30 = smov [#allocation28] }
 0x215   : >>> { %v715_v58 = vld [vmem:[%s2070_s21] sm:$0x3]  ;;  %v718_v10 = vmul.f32 %v714_v59, %v708_v57  ;;  %v721_v16 = vmul.f32 %v714_v59, %v706_v56 }
 0x216   : >>> { %v931_v60 = vld [vmem:[%s2065_s17] ss:$0 sm:$0xff]  ;;  %v1655_v62 = vld [vmem:[%s2065_s17 + $0x1] ss:$0 sm:$0xff]  ;;  %v726_v13 = vmul.f32 %v715_v58, %v708_v57  ;;  %v723_v14 = vmul.f32 %v715_v58, %v706_v56 }
 0x217   : >>> { %v1654_v61 = vld [vmem:[%s2065_s17 - $0x1] sm:$0x2]  ;;  %v1659_v2 = vld [vmem:[%s2074_s18 + $0x1] ss:$0 sm:$0xff] }
 0x218   : >>> { %v938_v63 = vsel %vm861_vm10, %v931_v60, %v1654_v61  ;;  %v955_v0 = vld [vmem:[%s2074_s18] ss:$0 sm:$0xff]  ;;  %v1657_v4 = vld [vmem:[%s930_s27 + $0x1] sm:$0x1] }
 0x219   : >>> { %v1658_v1 = vld [vmem:[%s2074_s18 - $0x1] sm:$0x2]  ;;  %941 = vst [vmem:[%s2065_s17] sm:$0x3] %v938_v63  ;;  %v950_v8 = vsel %vm873_vm11, %v1655_v62, %v1657_v4  ;;  %v1661_v9 = vld [vmem:[%s2079_s16 + $0x1] sm:$0x1] }
 0x21a   : >>> { %v942_v3 = vld [vmem:[%s930_s27] ss:$0 sm:$0xff]  ;;  %v962_v5 = vsel %vm861_vm10, %v955_v0, %v1658_v1  ;;  %v974_v12 = vsel %vm873_vm11, %v1659_v2, %v1661_v9 }
 0x21b   : >>> { %1656 = vst [vmem:[%s2065_s17 + $0x1] sm:$0x1] %v942_v3  ;;  %v966_v11 = vld [vmem:[%s2079_s16] ss:$0 sm:$0xff]  ;;  %s733_s17 = smov [#allocation20] }
 0x21c   : >>> { %952 = vst [vmem:[%s930_s27] sm:$0x3] %v950_v8  ;;  %v713_v15 = vld [vmem:[%s2082_s10] sm:$0x3]  ;;  %s2121_s27 = smov [#allocation23] }
 0x21d   : >>> { %965 = vst [vmem:[%s2074_s18] sm:$0x3] %v962_v5  ;;  %v716_v17 = vld [vmem:[%s712_s29] sm:$0x3]  ;;  %v717_v18 = vmul.f32 %v713_v15, %v706_v56  ;;  %v720_v19 = vmul.f32 %v713_v15, %v708_v57 }
 0x21e   : >>> { %1660 = vst [vmem:[%s2074_s18 + $0x1] sm:$0x1] %v966_v11  ;;  %v727_v20 = vmul.f32 %v716_v17, %v706_v56  ;;  %v724_v21 = vmul.f32 %v716_v17, %v708_v57  ;;  %v741_v26 = vld [vmem:[%s734_s24] ss:$0 sm:$0xff]  ;;  %s2123_s18 = smov [#allocation22]  ;;  %s2133_s24 = smov [#allocation21] }
 0x21f   : >>> { %976 = vst [vmem:[%s2079_s16] sm:$0x3] %v974_v12  ;;  %v719_v22 = vsub.f32 %v717_v18, %v718_v10  ;;  %v722_v25 = vadd.f32 %v721_v16, %v720_v19  ;;  %v782_v27 = vld [vmem:[%s775_s30] ss:$0 sm:$0xff]  ;;  %s1842_s16 = smov 1   ;;  %s854_s30 = smov [#allocation22] }
 0x220   : >>> { %v728_v23 = vadd.f32 %v727_v20, %v726_v13  ;;  %v725_v24 = vsub.f32 %v723_v14, %v724_v21 }
 0x221   : >>> { %729 = vst [vmem:[%s2082_s10] sm:$0x3] %v719_v22  ;;  %s790_s10 = smov [#allocation21] }
 0x222   : >>> { %732 = vst [vmem:[%s712_s29] sm:$0x3] %v728_v23  ;;  %s1843_s29 = smov 127  }
 0x223   : >>> { %731 = vst [vmem:[%s2070_s21] sm:$0x3] %v725_v24  ;;  %s748_s21 = smov [#allocation21] }
 0x224   : >>> { %730 = vst [vmem:[%s2072_s25] sm:$0x3] %v722_v25  ;;  %s2119_s25 = smov [#allocation20] }
 0x228   : >>> { %v742_v28 = vld [vmem:[%s733_s17] sm:$0x3] }
 0x229   : >>> { %v783_v29 = vld [vmem:[%s774_s23] sm:$0x3]  ;;  %v746_v30 = vsel %vm745_vm12, %v741_v26, %v742_v28 }
 0x22a   : >>> { %v787_v31 = vsel %vm786_vm13, %v782_v27, %v783_v29  ;;  %v768_v32 = vld [vmem:[%s761_s20] sm:$0x3]  ;;  %747 = vst [vmem:[%s733_s17] sm:$0x3] %v746_v30  ;;  %s853_s17 = smov [#allocation20] }
 0x22b   : >>> { %788 = vst [vmem:[%s774_s23] sm:$0x3] %v787_v31  ;;  %v772_v33 = vsel %vm771_vm14, 0.0, %v768_v32  ;;  %v755_v34 = vld [vmem:[%s748_s21] sm:$0x3]  ;;  %s878_s23 = smov [#allocation23] }
 0x22c   : >>> { %773 = vst [vmem:[%s761_s20] sm:$0x3] %v772_v33  ;;  %v759_v35 = vsel %vm758_vm15, 0.0, %v755_v34  ;;  %s977_s20 = sadd.s32 (%p494_p11), 1, %s1835_s28  }
 0x22d   : >>> { %760 = vst [vmem:[%s748_s21] sm:$0x3] %v759_v35  ;;  %s402_s21 = smov (%p494_p11), [#allocation20]  ;;  %p490_p12 = scmp.ge.s32.totalorder (%p494_p11), %s977_s20, 15 }
 0x22e   : >> { %s2291_s28 = smov (%p494_p11), %s977_s20 }
 0x231   : >>> { %v795_v36 = vld [vmem:[%s2119_s25] sm:$0x3] }
 0x232   : >>> { %v823_v37 = vld [vmem:[%s2121_s27] sm:$0x3]  ;;  %796 = vrot.lane.b32.xlu1 %v795_v36, %s1842_s16 }
 0x233   : >>> { %824 = vrot.lane.b32.xlu0 %v823_v37, %s1842_s16  ;;  %v827_v38 = vld [vmem:[%s2123_s18] sm:$0x3] }
 0x234   : >>> { %828 = vrot.lane.b32.xlu2 %v827_v38, %s1842_s16  ;;  %v791_v39 = vld [vmem:[%s790_s10] sm:$0x3] }
 0x235   : >>> { %v812_v40 = vld [vmem:[%s790_s10] sm:$0x3] }
 0x236   : >>> { %v844_v41 = vld [vmem:[%s2121_s27] sm:$0x3] }
 0x237   : >>> { %v794_v44 = vld [vmem:[%s2119_s25] sm:$0x3] }
 0x238   : >>> { %v826_v55 = vld [vmem:[%s2123_s18] sm:$0x3] }
 0x23a   : >>> { %792 = vrot.lane.b32.xlu1 %v791_v39, %s1842_s16 }
 0x23c   : >>> { %813 = vrot.lane.b32.xlu2 %v812_v40, %s1843_s29 }
 0x242   : >>> { %845 = vrot.lane.b32.xlu1 %v844_v41, %s1843_s29 }
 0x28e   : >>> { %v829_v42 = vpop.permute.xlu2 %828 }
 0x28f   : >>> { %v833_v51 = vsel %vm800_vm1, %v827_v38, %v829_v42 }
 0x296   : >>> { %v814_v43 = vpop.permute.xlu2 %813 }
 0x297   : >>> { %v818_v45 = vsel %vm804_vm0, %v794_v44, %v814_v43 }
 0x298   : >>> { %820 = vst [vmem:[%s790_s10] sm:$0x3] %v818_v45 }
 0x29f   : >>> { %v879_v46 = vld [vmem:[%s2133_s24] ss:$0 sm:$0xff]  ;;  %v1651_v48 = vld [vmem:[%s2133_s24 + $0x1] ss:$0 sm:$0xff] }
 0x2a0   : >>> { %v1650_v47 = vld [vmem:[%s2133_s24 - $0x1] sm:$0x2] }
 0x2a1   : >>> { %v886_v49 = vsel %vm861_vm10, %v879_v46, %v1650_v47 }
 0x2a2   : >>> { %889 = vst [vmem:[%s2133_s24] sm:$0x3] %v886_v49 }
 0x2a4   : >>> { %v797_v50 = vpop.permute.xlu1 %796 }
 0x2a5   : >>> { %v825_v52 = vpop.permute.xlu0 %824  ;;  %v801_v56 = vsel %vm800_vm1, %v795_v36, %v797_v50 }
 0x2a6   : >>> { %v837_v53 = vsel %vm804_vm0, %v825_v52, %v833_v51 }
 0x2a7   : >>> { %v843_v54 = vsel %vm1503_vm2, %v837_v53, 0.0 }
 0x2a8   : >>> { %851 = vst [vmem:[%s2123_s18] sm:$0x3] %v843_v54  ;;  %s455_s18 = smov (%p494_p11), [#allocation23] }
 0x2ac   : >>> { %v793_v57 = vpop.permute.xlu1 %792 }
 0x2ad   : >>> { %v805_v58 = vsel %vm804_vm0, %v793_v57, %v801_v56 }
 0x2ae   : >>> { %v811_v59 = vsel %vm1503_vm2, %v805_v58, 0.0 }
 0x2af   : >>> { %819 = vst [vmem:[%s2119_s25] sm:$0x3] %v811_v59  ;;  %v1649_v61 = vld [vmem:[%s854_s30 + $0x1] sm:$0x1]  ;;  %v866_v4 = vld [vmem:[%s854_s30] ss:$0 sm:$0xff]  ;;  %s421_s25 = smov (%p494_p11), [#allocation21] }
 0x2b4   : >>> { %v846_v60 = vpop.permute.xlu1 %845 }
 0x2b5   : >>> { %v850_v62 = vsel %vm804_vm0, %v826_v55, %v846_v60 }
 0x2b6   : >>> { %v855_v63 = vld [vmem:[%s853_s17] ss:$0 sm:$0xff]  ;;  %v1647_v1 = vld [vmem:[%s853_s17 + $0x1] ss:$0 sm:$0xff]  ;;  %852 = vst [vmem:[%s2121_s27] sm:$0x3] %v850_v62  ;;  %s438_s27 = smov (%p494_p11), [#allocation22] }
 0x2b7   : >>> { %v1646_v0 = vld [vmem:[%s853_s17 - $0x1] sm:$0x2]  ;;  %v874_v3 = vsel %vm873_vm11, %v1647_v1, %v1649_v61 }
 0x2b8   : >>> { %v862_v2 = vsel %vm861_vm10, %v855_v63, %v1646_v0  ;;  %876 = vst [vmem:[%s854_s30] sm:$0x3] %v874_v3 }
 0x2b9   : >>> { %865 = vst [vmem:[%s853_s17] sm:$0x3] %v862_v2 }
 0x2ba   : >>> { %1648 = vst [vmem:[%s853_s17 + $0x1] sm:$0x1] %v866_v4 }
 0x2bd   : >>> { %v890_v5 = vld [vmem:[%s878_s23] ss:$0 sm:$0xff]  ;;  %v1653_v8 = vld [vmem:[%s878_s23 + $0x1] sm:$0x1] }
 0x2be   : >>> { %1652 = vst [vmem:[%s2133_s24 + $0x1] sm:$0x1] %v890_v5  ;;  %v898_v9 = vsel %vm873_vm11, %v1651_v48, %v1653_v8  ;;  %496 = sbr.rel (!%p494_p11) target bundleno = 265 (0x109), region = 462 }
 0x2bf   : >>> { %900 = vst [vmem:[%s878_s23] sm:$0x3] %v898_v9  ;;  %v444_v14 = vld [vmem:[%s438_s27] sm:$0x3] (%p494_p11) }
 0x2c0   : >> { %v445_v18 = vsel (%p494_p11), %vm1503_vm2, %v444_v14, 0.0 }
 0x2c1   : >> { %v408_v10 = vld [vmem:[%s402_s21] sm:$0x3] (%p494_p11)  ;;  %v446_v20 = vmul.f32 (%p494_p11), %v445_v18, %v445_v18 }
 0x2c2   : >> { %v409_v12 = vsel (%p494_p11), %vm1503_vm2, %v408_v10, 0.0 }
 0x2c3   : >> { %v410_v16 = vmul.f32 %v409_v12, %v409_v12 }
 0x2c5   : >> { %v427_v11 = vld [vmem:[%s421_s25] sm:$0x3]  ;;  %v414_v23 = vsel %vm413_vm3, 0.0, %v410_v16 }
 0x2c6   : >> { %v428_v13 = vsel %vm1503_vm2, %v427_v11, 0.0  ;;  %v461_v15 = vld [vmem:[%s455_s18] sm:$0x3] }
 0x2c7   : >> { %v429_v17 = vmul.f32 %v428_v13, %v428_v13  ;;  %v462_v19 = vsel %vm1503_vm2, %v461_v15, 0.0 }
 0x2c8   : >> { %v463_v22 = vmul.f32 %v462_v19, %v462_v19 }
 0x2c9   : >> { %v431_v21 = vadd.f32 %v429_v17, %v410_v16  ;;  %v430_v25 = vadd.f32 %v429_v17, %v414_v23 }
 0x2ca   : >> { %v467_v28 = vsel %vm466_vm4, 0.0, %v463_v22 }
 0x2cb   : >> { %v448_v24 = vadd.f32 %v446_v20, %v431_v21  ;;  %v447_v27 = vadd.f32 %v446_v20, %v430_v25 }
 0x2cd   : >> { %v469_v26 = vadd.f32 %v463_v22, %v448_v24  ;;  %v468_v29 = vadd.f32 %v467_v28, %v447_v27 }
 0x2cf   : >> { %470 = vadd.xlane.f32.xlu0 %v469_v26 }
 0x2d7   : >> { %478 = vadd.xlane.f32.xlu0 %v468_v29 }
 0x342   : >> { %v471_v30 = vpop.xlane.xlu0 %470 }
 0x343   : >> { %v472_v31 = vrot.slane %v471_v30, 4 }
 0x345   : >> { %v473_v32 = vadd.f32 %v472_v31, %v471_v30 }
 0x347   : >> { %v474_v33 = vrot.slane %v473_v32, 2 }
 0x349   : >> { %v475_v37 = vadd.f32 %v474_v33, %v473_v32 }
 0x34a   : >> { %v479_v34 = vpop.xlane.xlu0 %478 }
 0x34b   : >> { %v480_v35 = vrot.slane %v479_v34, 4  ;;  %v476_v40 = vrot.slane %v475_v37, 1 }
 0x34d   : >> { %v481_v36 = vadd.f32 %v480_v35, %v479_v34  ;;  %v477_v43 = vadd.f32 %v476_v40, %v475_v37 }
 0x34f   : >> { %v482_v38 = vrot.slane %v481_v36, 2 }
 0x351   : >> { %v483_v39 = vadd.f32 %v482_v38, %v481_v36 }
 0x353   : >> { %v484_v41 = vrot.slane %v483_v39, 1 }
 0x355   : >> { %v485_v42 = vadd.f32 %v484_v41, %v483_v39 }
 0x357   : >> { %1681 = vpush %v485_v42 }
 0x358   : >> { %1683 = vpush %v477_v43 }
 0x388   : >> { %s1682_s19 = spop %1681 }
 0x389   : >> { %s1684_s16 = spop %1683 }
 0x38a   : >> { %s488_s10 = smul.f32 1e-10, %s1684_s16 }
 0x38c   : >> { %p489_p13 = scmp.le.f32.partialorder %s1682_s19, %s488_s10 }
 0x38e   : >> { %p491_p0 = por %p490_p12, %p489_p13 }
 0x390   : > { %979 = sbr.rel (!%p491_p0) target bundleno = 264 (0x108), region = 473 }
 0x395 PF: > { %s984_s29 = smov [#allocation20]  ;;  %v988_v6 = vmov %v1978_v6  ;;  %v991_v7 = vmov %v1980_v7  ;;  %v1038_v44 = vld [vmem:[#allocation12] sm:$0x3]  ;;  %v1044_v45 = vld [vmem:[#allocation14] sm:$0x3]  ;;  %s1004_s28 = smov [#allocation23] }
 0x396   : > { %v1008_v6 = vmov %v1978_v6  ;;  %v1011_v7 = vmov %v1980_v7  ;;  %v992_v46 = vld [vmem:[%s984_s29] sm:$0x3]  ;;  %vm995_vm5 = vcmp.eq.s32.totalorder %v991_v7, %v988_v6  ;;  %1041 = vst [vmem:[%s321_s9] sm:$0x3] %v1038_v44  ;;  %s2292_s24 = scalar_lea.vmem [#allocation15], %s1974_s26  ;;  %v1050_v48 = vld [vmem:[#allocation16] sm:$0x3] }
 0x397   : > { %vm1015_vm6 = vcmp.eq.s32.totalorder %v1011_v7, %v1008_v6  ;;  %v996_v47 = vsel %vm995_vm5, %v992_v46, 0.0  ;;  %1047 = vst [vmem:[%s2292_s24] sm:$0x3] %v1044_v45  ;;  %v1012_v50 = vld [vmem:[%s1004_s28] sm:$0x3]  ;;  %s2293_s30 = scalar_lea.vmem [#allocation17], %s1974_s26  ;;  %s2294_s17 = scalar_lea.vmem [#allocation19], %s1974_s26 }
 0x398   : > { %v997_v49 = vrot.slane %v996_v47, 4  ;;  %1053 = vst [vmem:[%s2293_s30] sm:$0x3] %v1050_v48  ;;  %v1056_v51 = vld [vmem:[#allocation18] sm:$0x3]  ;;  %v1016_v52 = vsel %vm1015_vm6, %v1012_v50, 0.0  ;;  %s980_s23 = sand.u32 7, %s1815_s11  }
 0x399   : > { %1059 = vst [vmem:[%s2294_s17] sm:$0x3] %v1056_v51  ;;  %v1017_v54 = vrot.slane %v1016_v52, 4  ;;  %s981_s20 = scalar_lea.vmem [#allocation8], %s980_s23  ;;  %s983_s21 = scalar_lea.vmem [#allocation10], %s980_s23 }
 0x39a   : > { %v998_v53 = vadd.f32 %v997_v49, %v996_v47  ;;  %s985_s20 = smov %s981_s20  ;;  %s1005_s21 = smov %s983_s21 }
 0x39b   : > { %v1018_v6 = vadd.f32 %v1017_v54, %v1016_v52  ;;  %s2295_s25 = scalar_lea.vmem [#allocation9], %s1976_s14  ;;  %s2296_s27 = scalar_lea.vmem [#allocation11], %s1976_s14 }
 0x39c   : > { %v999_v55 = vrot.slane %v998_v53, 2  ;;  %s1087_s18 = sshrl.u32 (%p1943_p4), %s1815_s11, 3  ;;  %s2297_s16 = scalar_lea.vmem (%p1943_p4), [#allocation9], %s1976_s14 }
 0x39d   : > { %v1019_v56 = vrot.slane %v1018_v6, 2  ;;  %s1088_s19 = sadd.s32 (%p1943_p4), %s1819_s12, %s1087_s18 }
 0x39e   : > { %v1000_v7 = vadd.f32 %v999_v55, %v998_v53  ;;  %s1668_s10 = sshll.u32 (%p1943_p4), %s1088_s19, 2 }
 0x39f   : > { %v1020_v58 = vadd.f32 %v1019_v56, %v1018_v6  ;;  %s1090_s24 = scalar_lea.vmem (%p1943_p4), %s2272_s4, %s1668_s10 }
 0x3a0   : > { %v1001_v57 = vrot.slane %v1000_v7, 1 }
 0x3a1   : > { %v1021_v60 = vrot.slane %v1020_v58, 1 }
 0x3a2   : > { %v1002_v59 = vadd.f32 %v1001_v57, %v1000_v7 }
 0x3a3   : > { %v1022_v61 = vadd.f32 %v1021_v60, %v1020_v58 }
 0x3a4   : > { %1003 = vst [vmem:[%s985_s20] sm:$0x1] %v1002_v59 }
 0x3a5   : > { %1023 = vst [vmem:[%s1005_s21] sm:$0x1] %v1022_v61 }
 0x3a9   : > { %1086 = sbr.rel (!%p1943_p4) target bundleno = 949 (0x3b5), region = 158 }
 0x3ab   : > { %v1026_v62 = vld [vmem:[#allocation8] sm:$0xf] }
 0x3ac   : > { %1029 = vst [vmem:[%s2295_s25] sm:$0xf] %v1026_v62  ;;  %v1032_v63 = vld [vmem:[#allocation10] sm:$0xf] }
 0x3ad   : > { %1035 = vst [vmem:[%s2296_s27] sm:$0xf] %v1032_v63 }
 0x3b3   : > { %v1107_v0 = vld [vmem:[%s2297_s16] sm:$0xf] }
 0x3b4   : > { %1108 = vst [vmem:[%s1090_s24] sm:$0xf] %v1107_v0 }
 0x3b5 PF: > { %1126 = sbr.rel (!%p1943_p4) target bundleno = 957 (0x3bd), region = 192  ;;  %s1127_s30 = sshrl.u32 (%p1943_p4), %s1815_s11, 3 }
 0x3b6   : > { %s1128_s17 = sadd.s32 (%p1943_p4), %s1819_s12, %s1127_s30  ;;  %s2298_s23 = scalar_lea.vmem (%p1943_p4), [#allocation11], %s1976_s14 }
 0x3b7   : > { %s1669_s20 = sshll.u32 (%p1943_p4), %s1128_s17, 2 }
 0x3b8   : > { %s1130_s27 = scalar_lea.vmem (%p1943_p4), %s2273_s5, %s1669_s20 }
 0x3bb   : > { %v1147_v1 = vld [vmem:[%s2298_s23] sm:$0xf] }
 0x3bc   : > { %1148 = vst [vmem:[%s1130_s27] sm:$0xf] %v1147_v1 }
 0x3bd PF: > { %s1685_s22 = smul.u32 3, %s1819_s12  ;;  %v1184_v2 = vld [vmem:[%s321_s9] sm:$0x3]  ;;  %s2299_s14 = scalar_lea.vmem [#allocation15], %s1974_s26 }
 0x3be   : > { %v1221_v3 = vld [vmem:[%s2299_s14] sm:$0x3]  ;;  %s2300_s17 = scalar_lea.vmem [#allocation17], %s1974_s26  ;;  %s2301_s21 = sld [smem:[#allocation38_spill]] }
 0x3bf   : > { %s1165_s18 = sadd.s32 %s1815_s11, %s1685_s22  ;;  %v1258_v4 = vld [vmem:[%s2300_s17] sm:$0x3]  ;;  %s2302_s27 = scalar_lea.vmem [#allocation19], %s1974_s26 }
 0x3c0   : > { %s1670_s19 = sshll.u32 %s1165_s18, 1  ;;  %v1295_v5 = vld [vmem:[%s2302_s27] sm:$0x3] }
 0x3c1   : > { %s1167_s29 = scalar_lea.vmem %s2274_s6, %s1670_s19  ;;  %s1204_s30 = scalar_lea.vmem %s2275_s7, %s1670_s19 }
 0x3c2   : > { %1185 = vst [vmem:[%s1167_s29] sm:$0x3] %v1184_v2  ;;  %s1241_s11 = scalar_lea.vmem %s2276_s8, %s1670_s19 }
 0x3c3   : > { %1222 = vst [vmem:[%s1204_s30] sm:$0x3] %v1221_v3 }
 0x3c4   : > { %s1278_s25 = scalar_lea.vmem %s2301_s21, %s1670_s19  ;;  %1259 = vst [vmem:[%s1241_s11] sm:$0x3] %v1258_v4 }
 0x3c5   : > { %1296 = vst [vmem:[%s1278_s25] sm:$0x3] %v1295_v5 }
 0x3c6 PF: > { %s16_s15 = sadd.s32 1, %s1831_s15   ;;  %s2303_s30 = sld [smem:[#allocation33_spill]] }
 0x3c7   : > { %p13_p1 = scmp.ge.s32.totalorder %s16_s15, 8   ;;  %s2304_s10 = sld [smem:[#allocation37_spill]] }
 0x3c8   : > { %s2305_s12 = sld [smem:[#allocation34_spill]]  ;;  %s2308_s11 = smov %s1823_s13 }
 0x3c9   : > { %s2306_s22 = sld [smem:[#allocation35_spill]] }
 0x3ca   : > { %s2307_s14 = sld [smem:[#allocation36_spill]] }
 0x3cb   :  { %15 = sbr.rel (!%p13_p1) target bundleno = 6 (0x6), region = 484 }
 0x3cf   : > { %s2309_s13 = smov %s2306_s22 }

// kernel: reverse
= control target key start
LH: loop header
LB: loop body
LE: loop exit
PB: predicated region body
PF: predicated region fallthrough
CT: control target
= control target key end

     0   :  { %v2_v0 = vlaneseq  ;;  %s152_s0 = inlined_call_operand.vmem [shape: f32[2,3,4], index: 0, kind: input, shape index: {}]   ;;  %s153_s1 = inlined_call_operand.vmem [shape: f32[2,3,4], index: 1, kind: output, shape index: {}]  }
   0x2   :  { %v3_v1 = vsub.s32 3, %v2_v0 }
   0x4   :  { %4 = vset.pattern.permute.xlu0 %v3_v1 }
   0x5   :  { %v21_v2 = vld [vmem:[%s152_s0] sm:$0xff]  }
   0x6   :  { %22 = vst [vmem:[#allocation1] sm:$0xff] %v21_v2  }
   0xd   :  { %v56_v3 = vld [vmem:[#allocation1] sm:$0xf]  ;;  %v53_v4 = vld [vmem:[#allocation1 + $0x4] sm:$0xf] }
   0xe   :  { %57 = vst [vmem:[#allocation0] sm:$0xf] %v56_v3 }
   0xf   :  { %55 = vst [vmem:[#allocation0 + $0x8] sm:$0xf] %v53_v4 }
  0x15   :  { %v58_v5 = vld [vmem:[#allocation0] sm:$0xff] }
  0x16   :  { %59 = vperm.xlu0 %4, %v58_v5   ;;  %v64_v6 = vld [vmem:[#allocation0 + $0x8] sm:$0xff] }
  0x1e   :  { %65 = vperm.xlu0 %4, %v64_v6  }
  0x88   :  { %v60_v7 = vpop.permute.xlu0 %59 }
  0x89   :  { %61 = vst [vmem:[#allocation2 + $0x8] sm:$0xff] %v60_v7 }
  0x90   :  { %v70_v8 = vld [vmem:[#allocation2 + $0x8] sm:$0xf]  ;;  %v66_v9 = vpop.permute.xlu0 %65 }
  0x91   :  { %73 = vst [vmem:[#allocation3] sm:$0xf] %v70_v8 }
  0x92   :  { %67 = vst [vmem:[#allocation2] sm:$0xff] %v66_v9 }
  0x98   :  { %v96_v10 = vld [vmem:[#allocation3] sm:$0xf] }
  0x99   :  { %97 = vst [vmem:[%s153_s1] sm:$0xf] %v96_v10  ;;  %v75_v11 = vld [vmem:[#allocation2] sm:$0xf] }
  0x9a   :  { %79 = vst [vmem:[#allocation3 + $0x4] sm:$0xf] %v75_v11 }
  0xa1   :  { %v98_v12 = vld [vmem:[#allocation3 + $0x4] sm:$0xf] }
  0xa2   :  { %99 = vst [vmem:[%s153_s1 + $0x4] sm:$0xf] %v98_v12 }

</bundles_post_ra>
